<compile_context>
chip_gen: v7x
topology: tpu7x:2x2x1
jax: 0.10.0
libtpu: 0.0.40
codegen_flags: <defaults>
</compile_context>

<pallas_src>
import functools

import jax
import jax.numpy as jnp
from jax.experimental import pallas as pl
from jax.experimental.pallas import tpu as pltpu


def conv_module_kernel(
    x_ref,       # (TT, C)        auto-pipelined center tile of the input
    x_hbm,       # (B, T, C)      full input left in HBM (pl.ANY) for halo DMAs
    w1_ref,      # (C, 2C)  bf16  pointwise #1 weight (LN gamma folded), GLU fused
    wdw_ref,     # (K, C)         depthwise taps with BN eval scale folded in
    vec_ref,     # (4, C)   f32   rows: [b1 value, b1 gate, BN shift, b2]
    w2_ref,      # (C, C)   bf16  pointwise #2 weight
    o_ref,       # (TT, C)        output tile
    gbuf,        # (2*P8 + TT, C) VMEM scratch: GLU output window (incl. halos)
    hbuf,        # (2, pad, C)    VMEM scratch: raw-x halo rows (0=left, 1=right)
    sem,         # (2,) DMA semaphores for the halo copies
    *,
    seq_len: int,
    time_tile: int,
    kernel_size: int,
    pad: int,
    p8: int,
    dw_dtype,
):
    b = pl.program_id(0)
    t = pl.program_id(1)
    TT = time_tile
    K = kernel_size
    C = o_ref.shape[-1]

    left_present = t > 0
    # The wrapper guarantees (T % TT == 0 or T % TT >= pad), so whenever this
    # is False the whole right-halo window lies at/after T ('same' padding).
    right_present = (t + 1) * TT + pad <= seq_len

    if pad > 0:
        # Kick off the tiny halo DMAs first; they complete under the center
        # compute below, so their latency is hidden.
        @pl.when(left_present)
        def _():
            ls = t * TT - pad
            pltpu.make_async_copy(
                x_hbm.at[b, pl.ds(ls, pad), :], hbuf.at[0], sem.at[0]).start()

        @pl.when(right_present)
        def _():
            rs = (t + 1) * TT
            pltpu.make_async_copy(
                x_hbm.at[b, pl.ds(rs, pad), :], hbuf.at[1], sem.at[1]).start()

        # Halo slots of the GLU buffer default to zero ('same' padding /
        # no stale data); overwritten below when the neighbour rows exist.
        gbuf[pl.ds(p8 - pad, pad), :] = jnp.zeros((pad, C), gbuf.dtype)
        gbuf[pl.ds(p8 + TT, pad), :] = jnp.zeros((pad, C), gbuf.dtype)

    def ln_pw1_glu(x_rows):
        """LayerNorm (affine folded into W1/b1) -> PW conv #1 -> GLU."""
        xf = x_rows.astype(jnp.float32)
        mean = jnp.mean(xf, axis=-1, keepdims=True)
        var = jnp.mean(jnp.square(xf - mean), axis=-1, keepdims=True)
        xh = ((xf - mean) * jax.lax.rsqrt(var + 1e-5)).astype(jnp.bfloat16)
        # Single fused (rows, C) x (C, 2C) bf16 MXU matmul; slice at column C
        # is lane-aligned when C % 128 == 0 (keep a split-weight variant only
        # if C is not a multiple of 128).
        y = jnp.dot(xh, w1_ref[...], preferred_element_type=jnp.float32)
        val = y[:, :C] + vec_ref[0:1, :]
        gate = y[:, C:] + vec_ref[1:2, :]
        return val * jax.nn.sigmoid(gate)                    # (rows, C) f32

    # ---- center rows [t*TT, t*TT + TT).  Rows past the real sequence (the
    # partial last tile delivers undefined data there) are forced to zero via
    # a select, so no NaN/garbage can reach the depthwise mix. ----
    g_c = ln_pw1_glu(x_ref[...])
    row = jax.lax.broadcasted_iota(jnp.int32, (TT, 1), 0) + t * TT
    g_c = jnp.where(row < seq_len, g_c, 0.0)
    gbuf[pl.ds(p8, TT), :] = g_c.astype(gbuf.dtype)

    if pad > 0:
        @pl.when(left_present)
        def _():
            pltpu.make_async_copy(
                x_hbm.at[b, pl.ds(t * TT - pad, pad), :],
                hbuf.at[0], sem.at[0]).wait()
            gbuf[pl.ds(p8 - pad, pad), :] = ln_pw1_glu(hbuf[0]).astype(gbuf.dtype)

        @pl.when(right_present)
        def _():
            pltpu.make_async_copy(
                x_hbm.at[b, pl.ds((t + 1) * TT, pad), :],
                hbuf.at[1], sem.at[1]).wait()
            gbuf[pl.ds(p8 + TT, pad), :] = ln_pw1_glu(hbuf[1]).astype(gbuf.dtype)

    # ---- DepthwiseConv1d (BN eval scale folded into the taps).  Shifted
    # windows are read back from VMEM (vector-load slot, not VALU register
    # realignment); tap math in bf16 on v6e/v7x, f32 on v5e; one promotion. --
    acc = jnp.zeros((TT, C), dw_dtype)
    for k in range(K):
        acc = acc + gbuf[pl.ds(p8 - pad + k, TT), :] * wdw_ref[k:k + 1, :]
    acc = acc.astype(jnp.float32)

    # ---- folded BatchNorm shift + Swish + PointwiseConv1d #2 (Dropout=id) --
    bn = acc + vec_ref[2:3, :]
    sw = bn * jax.nn.sigmoid(bn)
    out = jnp.dot(sw.astype(jnp.bfloat16), w2_ref[...],
                  preferred_element_type=jnp.float32) + vec_ref[3:4, :]
    o_ref[...] = out.astype(o_ref.dtype)


def _tpu_tuning():
    """Return (depthwise dtype, physical VMEM bytes) for the local TPU."""
    vmem_bytes = 64 * 1024 * 1024          # conservative default (v7x per-TC)
    try:
        vmem_bytes = int(pltpu.get_tpu_info().vmem_capacity_bytes)
    except Exception:
        pass
    try:
        kind = jax.devices()[0].device_kind.lower()
        # v5e and older have no bf16 VALU -> keep the depthwise in f32 there.
        bf16_vpu = not any(s in kind for s in ("v2", "v3", "v4", "v5"))
    except Exception:
        bf16_vpu = False
    dw_dtype = jnp.bfloat16 if bf16_vpu else jnp.float32
    return dw_dtype, vmem_bytes


def _pick_time_tile(T, pad, requested, C, vmem_bytes):
    """Largest multiple-of-8 tile <= requested that fits VMEM and keeps every
    non-final tile's right halo fully inside [0, T)."""
    # ~live VMEM bytes per time row: double-buffered in/out blocks, the GLU
    # window, and f32 intermediates including the (TT, 2C) pre-GLU matmul out.
    bytes_per_row = 48 * C
    cap = max(8, (int(vmem_bytes * 0.6) // bytes_per_row) // 8 * 8)
    lo = max(8, -(-pad // 8) * 8)
    full = -(-T // 8) * 8
    tt = max(lo, min(requested, cap, full) // 8 * 8)
    cand = tt
    while cand >= lo:
        if cand >= T or T % cand == 0 or T % cand >= pad:
            return cand
        cand -= 8
    # TODO(synk): pathological T/pad combination; fall back to a single tile.
    return full


def conformer_conv_module(x, params, kernel_size, *, time_tile=512):
    """x: (B, T, C) float32 -> (B, T, C) float32 (inference forward)."""
    B, T, C = x.shape
    K = kernel_size
    assert K % 2 == 1, "'same' depthwise padding assumes odd kernel_size"
    pad = (K - 1) // 2
    p8 = -(-pad // 8) * 8
    eps = 1e-5

    (ln_g, ln_b, w1, b1, wdw, bn_g, bn_b, bn_m, bn_v, w2, b2) = params

    dw_dtype, vmem_bytes = _tpu_tuning()
    TT = _pick_time_tile(T, pad, time_tile, C, vmem_bytes)
    nT = pl.cdiv(T, TT)
    assert TT % 8 == 0 and TT >= pad
    assert T % TT == 0 or T % TT >= pad or nT == 1

    # --- fold LayerNorm affine into pointwise conv #1 (GLU halves fused) ---
    w1f = ln_g.reshape(C, 1) * w1                    # (C, 2C)
    b1f = b1 + ln_b @ w1                             # (1, 2C)
    w1_bf = w1f.astype(jnp.bfloat16)

    # --- fold eval-mode BatchNorm into depthwise taps + per-channel shift ---
    bn_s = bn_g * jax.lax.rsqrt(bn_v + eps)          # (1, C)
    wdw_f = (wdw * bn_s).astype(dw_dtype)            # (K, C)
    shift = bn_b - bn_m * bn_s                       # (1, C)

    # pack the four (1, C) vectors into a single (4, C) input
    vec = jnp.concatenate([b1f[:, :C], b1f[:, C:], shift, b2], axis=0)
    w2_bf = w2.astype(jnp.bfloat16)

    kernel = functools.partial(
        conv_module_kernel, seq_len=T, time_tile=TT, kernel_size=K,
        pad=pad, p8=p8, dw_dtype=dw_dtype)

    vmem_limit = min(int(vmem_bytes * 3 // 4), 112 * 1024 * 1024)

    out = pl.pallas_call(
        kernel,
        out_shape=jax.ShapeDtypeStruct((B, T, C), x.dtype),
        grid=(B, nT),
        in_specs=[
            pl.BlockSpec((None, TT, C), lambda b, t: (b, t, 0)),  # center tile
            pl.BlockSpec(memory_space=pl.ANY),                    # halo source
            pl.BlockSpec((C, 2 * C), lambda b, t: (0, 0)),        # W1 (GLU fused)
            pl.BlockSpec((K, C), lambda b, t: (0, 0)),            # depthwise taps
            pl.BlockSpec((4, C), lambda b, t: (0, 0)),            # packed vectors
            pl.BlockSpec((C, C), lambda b, t: (0, 0)),            # W2
        ],
        out_specs=pl.BlockSpec((None, TT, C), lambda b, t: (b, t, 0)),
        scratch_shapes=[
            pltpu.VMEM((2 * p8 + TT, C), dw_dtype),               # GLU window
            pltpu.VMEM((2, max(pad, 1), C), x.dtype),             # halo rows
            pltpu.SemaphoreType.DMA((2,)),
        ],
        compiler_params=pltpu.CompilerParams(
            dimension_semantics=("parallel", "parallel"),
            vmem_limit_bytes=vmem_limit,
        ),
    )(x, x, w1_bf, wdw_f, vec, w2_bf)
    return out


def reference_conv_module(x, params, kernel_size):
    """Pure-JAX f32 reference with the original (unfolded) math."""
    (ln_g, ln_b, w1, b1, wdw, bn_g, bn_b, bn_m, bn_v, w2, b2) = params
    B, T, C = x.shape
    K = kernel_size
    pad = (K - 1) // 2

    mean = jnp.mean(x, axis=-1, keepdims=True)
    var = jnp.mean((x - mean) ** 2, axis=-1, keepdims=True)
    xn = (x - mean) / jnp.sqrt(var + 1e-5) * ln_g + ln_b

    y = xn @ w1 + b1
    g = y[..., :C] * jax.nn.sigmoid(y[..., C:])

    gp = jnp.pad(g, ((0, 0), (pad, pad), (0, 0)))
    acc = jnp.zeros((B, T, C), jnp.float32)
    for k in range(K):
        acc = acc + gp[:, k:k + T, :] * wdw[k]

    bn = (acc - bn_m) / jnp.sqrt(bn_v + 1e-5) * bn_g + bn_b
    sw = bn * jax.nn.sigmoid(bn)
    return sw @ w2 + b2


if __name__ == "__main__":
    # Small demo shapes.  C a multiple of 128 (lane-dense), T not a multiple
    # of the tile so the partial-tile + halo paths are exercised.
    B, T, C = 2, 200, 128
    K = 7                    # odd kernel_size (module default is 31)

    key = jax.random.PRNGKey(0)
    keys = jax.random.split(key, 12)

    x = jax.random.normal(keys[0], (B, T, C), jnp.float32)

    # Deterministic synthetic parameters (shapes follow the module's __init__;
    # PyTorch Conv1d weights would be transposed/squeezed to these layouts).
    ln_g = 1.0 + 0.1 * jax.random.normal(keys[1], (1, C), jnp.float32)
    ln_b = 0.1 * jax.random.normal(keys[2], (1, C), jnp.float32)
    w1 = 0.1 * jax.random.normal(keys[3], (C, 2 * C), jnp.float32)   # (in, out)
    b1 = 0.1 * jax.random.normal(keys[4], (1, 2 * C), jnp.float32)
    wdw = 0.1 * jax.random.normal(keys[5], (K, C), jnp.float32)      # (tap, channel)
    bn_g = 1.0 + 0.1 * jax.random.normal(keys[6], (1, C), jnp.float32)
    bn_b = 0.1 * jax.random.normal(keys[7], (1, C), jnp.float32)
    bn_m = 0.1 * jax.random.normal(keys[8], (1, C), jnp.float32)
    bn_v = 1.0 + 0.1 * jnp.abs(jax.random.normal(keys[9], (1, C), jnp.float32))
    w2 = 0.1 * jax.random.normal(keys[10], (C, C), jnp.float32)
    b2 = 0.1 * jax.random.normal(keys[11], (1, C), jnp.float32)

    params = (ln_g, ln_b, w1, b1, wdw, bn_g, bn_b, bn_m, bn_v, w2, b2)

    # time_tile=64 keeps multiple grid steps at this tiny demo length; the
    # production default is 512.
    out = conformer_conv_module(x, params, K, time_tile=64)
    out = jax.block_until_ready(out)

    ref = reference_conv_module(x, params, K)
    assert out.shape == (B, T, C)
    max_err = float(jnp.max(jnp.abs(out - ref)))
    # bf16 MXU operands (and bf16 depthwise on v6e/v7x) -> looser tolerance.
    assert jnp.allclose(out, ref, atol=3e-2, rtol=3e-2), (
        f"mismatch vs JAX reference (max abs err {max_err})")

    print("KERNEL_OK")
</pallas_src>

<mosaic_0001>
module attributes {stable_mosaic.version = 11 : i64} {
  func.func @conv_module_kernel(%arg0: i32, %arg1: i32, %arg2: memref<1x64x128xf32, #tpu.memory_space<vmem>>, %arg3: memref<2x200x128xf32, #tpu.memory_space<any>>, %arg4: memref<128x256xbf16, #tpu.memory_space<vmem>>, %arg5: memref<7x128xbf16, #tpu.memory_space<vmem>>, %arg6: memref<4x128xf32, #tpu.memory_space<vmem>>, %arg7: memref<128x128xbf16, #tpu.memory_space<vmem>>, %arg8: memref<1x64x128xf32, #tpu.memory_space<vmem>>, %arg9: memref<80x128xbf16, #tpu.memory_space<vmem>>, %arg10: memref<2x3x128xf32, #tpu.memory_space<vmem>>, %arg11: memref<2x!tpu.dma_semaphore, #tpu.memory_space<semaphore_mem>>) attributes {dimension_semantics = [#tpu.dimension_semantics<parallel>, #tpu.dimension_semantics<parallel>], iteration_bounds = array<i64: 2, 4>, scalar_prefetch = 0 : i64, scratch_operands = 3 : i64, tpu.core_type = #tpu.core_type<tc>, window_params = [{transform_indices = @transform_0, window_bounds = array<i64: 1, 64, 128>}, {}, {pipeline_mode = #tpu.pipeline_mode<synchronous>, transform_indices = @transform_2, window_bounds = array<i64: 128, 256>}, {pipeline_mode = #tpu.pipeline_mode<synchronous>, transform_indices = @transform_3, window_bounds = array<i64: 7, 128>}, {pipeline_mode = #tpu.pipeline_mode<synchronous>, transform_indices = @transform_4, window_bounds = array<i64: 4, 128>}, {pipeline_mode = #tpu.pipeline_mode<synchronous>, transform_indices = @transform_5, window_bounds = array<i64: 128, 128>}, {transform_indices = @transform_6, window_bounds = array<i64: 1, 64, 128>}]} {
    %c0_i32 = arith.constant 0 : i32
    %0 = arith.cmpi sgt, %arg1, %c0_i32 : i32
    %c1_i32 = arith.constant 1 : i32
    %1 = arith.addi %arg1, %c1_i32 : i32
    %c64_i32 = arith.constant 64 : i32
    %2 = arith.muli %1, %c64_i32 : i32
    %c3_i32 = arith.constant 3 : i32
    %3 = arith.addi %2, %c3_i32 : i32
    %c200_i32 = arith.constant 200 : i32
    %4 = arith.cmpi sle, %3, %c200_i32 : i32
    %5 = arith.extui %0 : i1 to i32
    %c0_i32_0 = arith.constant 0 : i32
    %6 = arith.cmpi ne, %5, %c0_i32_0 : i32
    scf.if %6 {
      %c64_i32_57 = arith.constant 64 : i32
      %121 = arith.muli %arg1, %c64_i32_57 : i32
      %c3_i32_58 = arith.constant 3 : i32
      %122 = arith.subi %121, %c3_i32_58 : i32
      %c0_i32_59 = arith.constant 0 : i32
      %c0_i32_60 = arith.constant 0 : i32
      %c0_i32_61 = arith.constant 0 : i32
      %123 = tpu.memref_slice %arg3[%arg0, %122, %c0_i32_61] : memref<2x200x128xf32, #tpu.memory_space<any>> -> memref<1x3x128xf32, #tpu.memory_space<any>>
      %124 = tpu.memref_squeeze %123 : memref<1x3x128xf32, #tpu.memory_space<any>> -> memref<3x128xf32, #tpu.memory_space<any>>
      %c0_i32_62 = arith.constant 0 : i32
      %c0_i32_63 = arith.constant 0 : i32
      %125 = tpu.memref_slice %arg10[%c0_i32_59, %c0_i32_62, %c0_i32_63] : memref<2x3x128xf32, #tpu.memory_space<vmem>> -> memref<1x3x128xf32, #tpu.memory_space<vmem>>
      %126 = tpu.memref_squeeze %125 : memref<1x3x128xf32, #tpu.memory_space<vmem>> -> memref<3x128xf32, #tpu.memory_space<vmem>>
      %127 = tpu.memref_slice %arg11[%c0_i32_60] : memref<2x!tpu.dma_semaphore, #tpu.memory_space<semaphore_mem>> -> memref<1x!tpu.dma_semaphore, #tpu.memory_space<semaphore_mem>>
      %128 = tpu.memref_squeeze %127 : memref<1x!tpu.dma_semaphore, #tpu.memory_space<semaphore_mem>> -> memref<!tpu.dma_semaphore, #tpu.memory_space<semaphore_mem>>
      tpu.enqueue_dma source(%124 : memref<3x128xf32, #tpu.memory_space<any>>) target(%126 : memref<3x128xf32, #tpu.memory_space<vmem>>) target_semaphore(%128 : memref<!tpu.dma_semaphore, #tpu.memory_space<semaphore_mem>>)
    } else {
    }
    %7 = arith.extui %4 : i1 to i32
    %c0_i32_1 = arith.constant 0 : i32
    %8 = arith.cmpi ne, %7, %c0_i32_1 : i32
    scf.if %8 {
      %c1_i32_57 = arith.constant 1 : i32
      %121 = arith.addi %arg1, %c1_i32_57 : i32
      %c64_i32_58 = arith.constant 64 : i32
      %122 = arith.muli %121, %c64_i32_58 : i32
      %c1_i32_59 = arith.constant 1 : i32
      %c1_i32_60 = arith.constant 1 : i32
      %c0_i32_61 = arith.constant 0 : i32
      %123 = tpu.memref_slice %arg3[%arg0, %122, %c0_i32_61] : memref<2x200x128xf32, #tpu.memory_space<any>> -> memref<1x3x128xf32, #tpu.memory_space<any>>
      %124 = tpu.memref_squeeze %123 : memref<1x3x128xf32, #tpu.memory_space<any>> -> memref<3x128xf32, #tpu.memory_space<any>>
      %c0_i32_62 = arith.constant 0 : i32
      %c0_i32_63 = arith.constant 0 : i32
      %125 = tpu.memref_slice %arg10[%c1_i32_59, %c0_i32_62, %c0_i32_63] : memref<2x3x128xf32, #tpu.memory_space<vmem>> -> memref<1x3x128xf32, #tpu.memory_space<vmem>>
      %126 = tpu.memref_squeeze %125 : memref<1x3x128xf32, #tpu.memory_space<vmem>> -> memref<3x128xf32, #tpu.memory_space<vmem>>
      %127 = tpu.memref_slice %arg11[%c1_i32_60] : memref<2x!tpu.dma_semaphore, #tpu.memory_space<semaphore_mem>> -> memref<1x!tpu.dma_semaphore, #tpu.memory_space<semaphore_mem>>
      %128 = tpu.memref_squeeze %127 : memref<1x!tpu.dma_semaphore, #tpu.memory_space<semaphore_mem>> -> memref<!tpu.dma_semaphore, #tpu.memory_space<semaphore_mem>>
      tpu.enqueue_dma source(%124 : memref<3x128xf32, #tpu.memory_space<any>>) target(%126 : memref<3x128xf32, #tpu.memory_space<vmem>>) target_semaphore(%128 : memref<!tpu.dma_semaphore, #tpu.memory_space<semaphore_mem>>)
    } else {
    }
    %cst = arith.constant 0.000000e+00 : bf16
    %9 = vector.broadcast %cst : bf16 to vector<3x128xbf16>
    %c5 = arith.constant 5 : index
    %c0 = arith.constant 0 : index
    %10 = vector.load %arg9[%c5, %c0] : memref<80x128xbf16, #tpu.memory_space<vmem>>, vector<3x128xbf16>
    tpu.vector_store %arg9[%c5, %c0], %9 {strides = array<i32>} : memref<80x128xbf16, #tpu.memory_space<vmem>>, vector<3x128xbf16>,
    %cst_2 = arith.constant 0.000000e+00 : bf16
    %11 = vector.broadcast %cst_2 : bf16 to vector<3x128xbf16>
    %c72 = arith.constant 72 : index
    %c0_3 = arith.constant 0 : index
    %12 = vector.load %arg9[%c72, %c0_3] : memref<80x128xbf16, #tpu.memory_space<vmem>>, vector<3x128xbf16>
    tpu.vector_store %arg9[%c72, %c0_3], %11 {strides = array<i32>} : memref<80x128xbf16, #tpu.memory_space<vmem>>, vector<3x128xbf16>,
    %c0_4 = arith.constant 0 : index
    %c0_5 = arith.constant 0 : index
    %c0_6 = arith.constant 0 : index
    %13 = vector.load %arg2[%c0_4, %c0_5, %c0_6] : memref<1x64x128xf32, #tpu.memory_space<vmem>>, vector<1x64x128xf32>
    %14 = vector.shape_cast %13 : vector<1x64x128xf32> to vector<64x128xf32>
    %cst_7 = arith.constant dense<0.000000e+00> : vector<64xf32>
    %15 = vector.multi_reduction <add>, %14, %cst_7 [1] : vector<64x128xf32> to vector<64xf32>
    %16 = vector.shape_cast %15 : vector<64xf32> to vector<64x1xf32>
    %cst_8 = arith.constant 1.280000e+02 : f32
    %17 = vector.broadcast %cst_8 : f32 to vector<64x1xf32>
    %18 = arith.divf %16, %17 : vector<64x1xf32>
    %19 = vector.broadcast %18 : vector<64x1xf32> to vector<64x128xf32>
    %20 = arith.subf %14, %19 : vector<64x128xf32>
    %21 = arith.mulf %20, %20 : vector<64x128xf32>
    %cst_9 = arith.constant dense<0.000000e+00> : vector<64xf32>
    %22 = vector.multi_reduction <add>, %21, %cst_9 [1] : vector<64x128xf32> to vector<64xf32>
    %23 = vector.shape_cast %22 : vector<64xf32> to vector<64x1xf32>
    %cst_10 = arith.constant 1.280000e+02 : f32
    %24 = vector.broadcast %cst_10 : f32 to vector<64x1xf32>
    %25 = arith.divf %23, %24 : vector<64x1xf32>
    %26 = vector.broadcast %18 : vector<64x1xf32> to vector<64x128xf32>
    %27 = arith.subf %14, %26 : vector<64x128xf32>
    %cst_11 = arith.constant 9.99999974E-6 : f32
    %28 = vector.broadcast %cst_11 : f32 to vector<64x1xf32>
    %29 = arith.addf %25, %28 : vector<64x1xf32>
    %30 = math.rsqrt %29 : vector<64x1xf32>
    %31 = vector.broadcast %30 : vector<64x1xf32> to vector<64x128xf32>
    %32 = arith.mulf %27, %31 : vector<64x128xf32>
    %33 = arith.truncf %32 : vector<64x128xf32> to vector<64x128xbf16>
    %c0_12 = arith.constant 0 : index
    %c0_13 = arith.constant 0 : index
    %34 = vector.load %arg4[%c0_12, %c0_13] : memref<128x256xbf16, #tpu.memory_space<vmem>>, vector<128x256xbf16>
    %cst_14 = arith.constant dense<0.000000e+00> : vector<64x256xf32>
    %35 = tpu.matmul %33, %34, %cst_14 {dimension_numbers = #tpu.dot_dimension_numbers<[1], [0], [0], [1], [0, 0, 1, 1], [], []>} : vector<64x128xbf16>, vector<128x256xbf16>, vector<64x256xf32> -> vector<64x256xf32>
    %36 = vector.extract_strided_slice %35 {offsets = [0, 0], sizes = [64, 128], strides = [1, 1]} : vector<64x256xf32> to vector<64x128xf32>
    %c0_15 = arith.constant 0 : index
    %c0_16 = arith.constant 0 : index
    %37 = vector.load %arg6[%c0_15, %c0_16] : memref<4x128xf32, #tpu.memory_space<vmem>>, vector<1x128xf32>
    %38 = vector.broadcast %37 : vector<1x128xf32> to vector<64x128xf32>
    %39 = arith.addf %36, %38 : vector<64x128xf32>
    %40 = vector.extract_strided_slice %35 {offsets = [0, 128], sizes = [64, 128], strides = [1, 1]} : vector<64x256xf32> to vector<64x128xf32>
    %c1 = arith.constant 1 : index
    %c0_17 = arith.constant 0 : index
    %41 = vector.load %arg6[%c1, %c0_17] : memref<4x128xf32, #tpu.memory_space<vmem>>, vector<1x128xf32>
    %42 = vector.broadcast %41 : vector<1x128xf32> to vector<64x128xf32>
    %43 = arith.addf %40, %42 : vector<64x128xf32>
    %44 = arith.negf %43 : vector<64x128xf32>
    %45 = math.exp %44 : vector<64x128xf32>
    %cst_18 = arith.constant 1.000000e+00 : f32
    %46 = vector.broadcast %cst_18 : f32 to vector<64x128xf32>
    %47 = arith.addf %46, %45 : vector<64x128xf32>
    %48 = arith.divf %46, %47 : vector<64x128xf32>
    %49 = arith.mulf %39, %48 : vector<64x128xf32>
    %50 = tpu.iota {dimensions = array<i32: 0>} : vector<64x1xi32>
    %c64_i32_19 = arith.constant 64 : i32
    %51 = arith.muli %arg1, %c64_i32_19 : i32
    %52 = vector.broadcast %51 : i32 to vector<64x1xi32>
    %53 = arith.addi %50, %52 : vector<64x1xi32>
    %c200_i32_20 = arith.constant 200 : i32
    %54 = vector.broadcast %c200_i32_20 : i32 to vector<64x1xi32>
    %55 = arith.cmpi slt, %53, %54 : vector<64x1xi32>
    %cst_21 = arith.constant 0.000000e+00 : f32
    %56 = vector.shape_cast %55 : vector<64x1xi1> to vector<64x1xi1>
    %57 = vector.broadcast %56 : vector<64x1xi1> to vector<64x128xi1>
    %58 = vector.broadcast %cst_21 : f32 to vector<64x128xf32>
    %59 = arith.select %57, %49, %58 : vector<64x128xi1>, vector<64x128xf32>
    %60 = arith.truncf %59 : vector<64x128xf32> to vector<64x128xbf16>
    %c8 = arith.constant 8 : index
    %c0_22 = arith.constant 0 : index
    %61 = vector.load %arg9[%c8, %c0_22] : memref<80x128xbf16, #tpu.memory_space<vmem>>, vector<64x128xbf16>
    tpu.vector_store %arg9[%c8, %c0_22], %60 {strides = array<i32>} : memref<80x128xbf16, #tpu.memory_space<vmem>>, vector<64x128xbf16>,
    %62 = arith.extui %0 : i1 to i32
    %c0_i32_23 = arith.constant 0 : i32
    %63 = arith.cmpi ne, %62, %c0_i32_23 : i32
    scf.if %63 {
      %c64_i32_57 = arith.constant 64 : i32
      %121 = arith.muli %arg1, %c64_i32_57 : i32
      %c3_i32_58 = arith.constant 3 : i32
      %122 = arith.subi %121, %c3_i32_58 : i32
      %c0_i32_59 = arith.constant 0 : i32
      %c0_i32_60 = arith.constant 0 : i32
      %c0_i32_61 = arith.constant 0 : i32
      %123 = tpu.memref_slice %arg3[%arg0, %122, %c0_i32_61] : memref<2x200x128xf32, #tpu.memory_space<any>> -> memref<1x3x128xf32, #tpu.memory_space<any>>
      %124 = tpu.memref_squeeze %123 : memref<1x3x128xf32, #tpu.memory_space<any>> -> memref<3x128xf32, #tpu.memory_space<any>>
      %c0_i32_62 = arith.constant 0 : i32
      %c0_i32_63 = arith.constant 0 : i32
      %125 = tpu.memref_slice %arg10[%c0_i32_59, %c0_i32_62, %c0_i32_63] : memref<2x3x128xf32, #tpu.memory_space<vmem>> -> memref<1x3x128xf32, #tpu.memory_space<vmem>>
      %126 = tpu.memref_squeeze %125 : memref<1x3x128xf32, #tpu.memory_space<vmem>> -> memref<3x128xf32, #tpu.memory_space<vmem>>
      %127 = tpu.memref_slice %arg11[%c0_i32_60] : memref<2x!tpu.dma_semaphore, #tpu.memory_space<semaphore_mem>> -> memref<1x!tpu.dma_semaphore, #tpu.memory_space<semaphore_mem>>
      %128 = tpu.memref_squeeze %127 : memref<1x!tpu.dma_semaphore, #tpu.memory_space<semaphore_mem>> -> memref<!tpu.dma_semaphore, #tpu.memory_space<semaphore_mem>>
      tpu.wait_dma2 semaphore(%128 : memref<!tpu.dma_semaphore, #tpu.memory_space<semaphore_mem>>) src(%124 : memref<3x128xf32, #tpu.memory_space<any>>) dst(%126 : memref<3x128xf32, #tpu.memory_space<vmem>>)
      %c0_64 = arith.constant 0 : index
      %c0_65 = arith.constant 0 : index
      %c0_66 = arith.constant 0 : index
      %129 = vector.load %arg10[%c0_64, %c0_65, %c0_66] : memref<2x3x128xf32, #tpu.memory_space<vmem>>, vector<1x3x128xf32>
      %130 = vector.shape_cast %129 : vector<1x3x128xf32> to vector<3x128xf32>
      %cst_67 = arith.constant dense<0.000000e+00> : vector<3xf32>
      %131 = vector.multi_reduction <add>, %130, %cst_67 [1] : vector<3x128xf32> to vector<3xf32>
      %132 = vector.shape_cast %131 : vector<3xf32> to vector<3x1xf32>
      %cst_68 = arith.constant 1.280000e+02 : f32
      %133 = vector.broadcast %cst_68 : f32 to vector<3x1xf32>
      %134 = arith.divf %132, %133 : vector<3x1xf32>
      %135 = vector.broadcast %134 : vector<3x1xf32> to vector<3x128xf32>
      %136 = arith.subf %130, %135 : vector<3x128xf32>
      %137 = arith.mulf %136, %136 : vector<3x128xf32>
      %cst_69 = arith.constant dense<0.000000e+00> : vector<3xf32>
      %138 = vector.multi_reduction <add>, %137, %cst_69 [1] : vector<3x128xf32> to vector<3xf32>
      %139 = vector.shape_cast %138 : vector<3xf32> to vector<3x1xf32>
      %cst_70 = arith.constant 1.280000e+02 : f32
      %140 = vector.broadcast %cst_70 : f32 to vector<3x1xf32>
      %141 = arith.divf %139, %140 : vector<3x1xf32>
      %142 = vector.broadcast %134 : vector<3x1xf32> to vector<3x128xf32>
      %143 = arith.subf %130, %142 : vector<3x128xf32>
      %cst_71 = arith.constant 9.99999974E-6 : f32
      %144 = vector.broadcast %cst_71 : f32 to vector<3x1xf32>
      %145 = arith.addf %141, %144 : vector<3x1xf32>
      %146 = math.rsqrt %145 : vector<3x1xf32>
      %147 = vector.broadcast %146 : vector<3x1xf32> to vector<3x128xf32>
      %148 = arith.mulf %143, %147 : vector<3x128xf32>
      %149 = arith.truncf %148 : vector<3x128xf32> to vector<3x128xbf16>
      %c0_72 = arith.constant 0 : index
      %c0_73 = arith.constant 0 : index
      %150 = vector.load %arg4[%c0_72, %c0_73] : memref<128x256xbf16, #tpu.memory_space<vmem>>, vector<128x256xbf16>
      %cst_74 = arith.constant dense<0.000000e+00> : vector<3x256xf32>
      %151 = tpu.matmul %149, %150, %cst_74 {dimension_numbers = #tpu.dot_dimension_numbers<[1], [0], [0], [1], [0, 0, 1, 1], [], []>} : vector<3x128xbf16>, vector<128x256xbf16>, vector<3x256xf32> -> vector<3x256xf32>
      %152 = vector.extract_strided_slice %151 {offsets = [0, 0], sizes = [3, 128], strides = [1, 1]} : vector<3x256xf32> to vector<3x128xf32>
      %c0_75 = arith.constant 0 : index
      %c0_76 = arith.constant 0 : index
      %153 = vector.load %arg6[%c0_75, %c0_76] : memref<4x128xf32, #tpu.memory_space<vmem>>, vector<1x128xf32>
      %154 = vector.broadcast %153 : vector<1x128xf32> to vector<3x128xf32>
      %155 = arith.addf %152, %154 : vector<3x128xf32>
      %156 = vector.extract_strided_slice %151 {offsets = [0, 128], sizes = [3, 128], strides = [1, 1]} : vector<3x256xf32> to vector<3x128xf32>
      %c1_77 = arith.constant 1 : index
      %c0_78 = arith.constant 0 : index
      %157 = vector.load %arg6[%c1_77, %c0_78] : memref<4x128xf32, #tpu.memory_space<vmem>>, vector<1x128xf32>
      %158 = vector.broadcast %157 : vector<1x128xf32> to vector<3x128xf32>
      %159 = arith.addf %156, %158 : vector<3x128xf32>
      %160 = arith.negf %159 : vector<3x128xf32>
      %161 = math.exp %160 : vector<3x128xf32>
      %cst_79 = arith.constant 1.000000e+00 : f32
      %162 = vector.broadcast %cst_79 : f32 to vector<3x128xf32>
      %163 = arith.addf %162, %161 : vector<3x128xf32>
      %164 = arith.divf %162, %163 : vector<3x128xf32>
      %165 = arith.mulf %155, %164 : vector<3x128xf32>
      %166 = arith.truncf %165 : vector<3x128xf32> to vector<3x128xbf16>
      %c5_80 = arith.constant 5 : index
      %c0_81 = arith.constant 0 : index
      %167 = vector.load %arg9[%c5_80, %c0_81] : memref<80x128xbf16, #tpu.memory_space<vmem>>, vector<3x128xbf16>
      tpu.vector_store %arg9[%c5_80, %c0_81], %166 {strides = array<i32>} : memref<80x128xbf16, #tpu.memory_space<vmem>>, vector<3x128xbf16>,
    } else {
    }
    %64 = arith.extui %4 : i1 to i32
    %c0_i32_24 = arith.constant 0 : i32
    %65 = arith.cmpi ne, %64, %c0_i32_24 : i32
    scf.if %65 {
      %c1_i32_57 = arith.constant 1 : i32
      %121 = arith.addi %arg1, %c1_i32_57 : i32
      %c64_i32_58 = arith.constant 64 : i32
      %122 = arith.muli %121, %c64_i32_58 : i32
      %c1_i32_59 = arith.constant 1 : i32
      %c1_i32_60 = arith.constant 1 : i32
      %c0_i32_61 = arith.constant 0 : i32
      %123 = tpu.memref_slice %arg3[%arg0, %122, %c0_i32_61] : memref<2x200x128xf32, #tpu.memory_space<any>> -> memref<1x3x128xf32, #tpu.memory_space<any>>
      %124 = tpu.memref_squeeze %123 : memref<1x3x128xf32, #tpu.memory_space<any>> -> memref<3x128xf32, #tpu.memory_space<any>>
      %c0_i32_62 = arith.constant 0 : i32
      %c0_i32_63 = arith.constant 0 : i32
      %125 = tpu.memref_slice %arg10[%c1_i32_59, %c0_i32_62, %c0_i32_63] : memref<2x3x128xf32, #tpu.memory_space<vmem>> -> memref<1x3x128xf32, #tpu.memory_space<vmem>>
      %126 = tpu.memref_squeeze %125 : memref<1x3x128xf32, #tpu.memory_space<vmem>> -> memref<3x128xf32, #tpu.memory_space<vmem>>
      %127 = tpu.memref_slice %arg11[%c1_i32_60] : memref<2x!tpu.dma_semaphore, #tpu.memory_space<semaphore_mem>> -> memref<1x!tpu.dma_semaphore, #tpu.memory_space<semaphore_mem>>
      %128 = tpu.memref_squeeze %127 : memref<1x!tpu.dma_semaphore, #tpu.memory_space<semaphore_mem>> -> memref<!tpu.dma_semaphore, #tpu.memory_space<semaphore_mem>>
      tpu.wait_dma2 semaphore(%128 : memref<!tpu.dma_semaphore, #tpu.memory_space<semaphore_mem>>) src(%124 : memref<3x128xf32, #tpu.memory_space<any>>) dst(%126 : memref<3x128xf32, #tpu.memory_space<vmem>>)
      %c1_64 = arith.constant 1 : index
      %c0_65 = arith.constant 0 : index
      %c0_66 = arith.constant 0 : index
      %129 = vector.load %arg10[%c1_64, %c0_65, %c0_66] : memref<2x3x128xf32, #tpu.memory_space<vmem>>, vector<1x3x128xf32>
      %130 = vector.shape_cast %129 : vector<1x3x128xf32> to vector<3x128xf32>
      %cst_67 = arith.constant dense<0.000000e+00> : vector<3xf32>
      %131 = vector.multi_reduction <add>, %130, %cst_67 [1] : vector<3x128xf32> to vector<3xf32>
      %132 = vector.shape_cast %131 : vector<3xf32> to vector<3x1xf32>
      %cst_68 = arith.constant 1.280000e+02 : f32
      %133 = vector.broadcast %cst_68 : f32 to vector<3x1xf32>
      %134 = arith.divf %132, %133 : vector<3x1xf32>
      %135 = vector.broadcast %134 : vector<3x1xf32> to vector<3x128xf32>
      %136 = arith.subf %130, %135 : vector<3x128xf32>
      %137 = arith.mulf %136, %136 : vector<3x128xf32>
      %cst_69 = arith.constant dense<0.000000e+00> : vector<3xf32>
      %138 = vector.multi_reduction <add>, %137, %cst_69 [1] : vector<3x128xf32> to vector<3xf32>
      %139 = vector.shape_cast %138 : vector<3xf32> to vector<3x1xf32>
      %cst_70 = arith.constant 1.280000e+02 : f32
      %140 = vector.broadcast %cst_70 : f32 to vector<3x1xf32>
      %141 = arith.divf %139, %140 : vector<3x1xf32>
      %142 = vector.broadcast %134 : vector<3x1xf32> to vector<3x128xf32>
      %143 = arith.subf %130, %142 : vector<3x128xf32>
      %cst_71 = arith.constant 9.99999974E-6 : f32
      %144 = vector.broadcast %cst_71 : f32 to vector<3x1xf32>
      %145 = arith.addf %141, %144 : vector<3x1xf32>
      %146 = math.rsqrt %145 : vector<3x1xf32>
      %147 = vector.broadcast %146 : vector<3x1xf32> to vector<3x128xf32>
      %148 = arith.mulf %143, %147 : vector<3x128xf32>
      %149 = arith.truncf %148 : vector<3x128xf32> to vector<3x128xbf16>
      %c0_72 = arith.constant 0 : index
      %c0_73 = arith.constant 0 : index
      %150 = vector.load %arg4[%c0_72, %c0_73] : memref<128x256xbf16, #tpu.memory_space<vmem>>, vector<128x256xbf16>
      %cst_74 = arith.constant dense<0.000000e+00> : vector<3x256xf32>
      %151 = tpu.matmul %149, %150, %cst_74 {dimension_numbers = #tpu.dot_dimension_numbers<[1], [0], [0], [1], [0, 0, 1, 1], [], []>} : vector<3x128xbf16>, vector<128x256xbf16>, vector<3x256xf32> -> vector<3x256xf32>
      %152 = vector.extract_strided_slice %151 {offsets = [0, 0], sizes = [3, 128], strides = [1, 1]} : vector<3x256xf32> to vector<3x128xf32>
      %c0_75 = arith.constant 0 : index
      %c0_76 = arith.constant 0 : index
      %153 = vector.load %arg6[%c0_75, %c0_76] : memref<4x128xf32, #tpu.memory_space<vmem>>, vector<1x128xf32>
      %154 = vector.broadcast %153 : vector<1x128xf32> to vector<3x128xf32>
      %155 = arith.addf %152, %154 : vector<3x128xf32>
      %156 = vector.extract_strided_slice %151 {offsets = [0, 128], sizes = [3, 128], strides = [1, 1]} : vector<3x256xf32> to vector<3x128xf32>
      %c1_77 = arith.constant 1 : index
      %c0_78 = arith.constant 0 : index
      %157 = vector.load %arg6[%c1_77, %c0_78] : memref<4x128xf32, #tpu.memory_space<vmem>>, vector<1x128xf32>
      %158 = vector.broadcast %157 : vector<1x128xf32> to vector<3x128xf32>
      %159 = arith.addf %156, %158 : vector<3x128xf32>
      %160 = arith.negf %159 : vector<3x128xf32>
      %161 = math.exp %160 : vector<3x128xf32>
      %cst_79 = arith.constant 1.000000e+00 : f32
      %162 = vector.broadcast %cst_79 : f32 to vector<3x128xf32>
      %163 = arith.addf %162, %161 : vector<3x128xf32>
      %164 = arith.divf %162, %163 : vector<3x128xf32>
      %165 = arith.mulf %155, %164 : vector<3x128xf32>
      %166 = arith.truncf %165 : vector<3x128xf32> to vector<3x128xbf16>
      %c72_80 = arith.constant 72 : index
      %c0_81 = arith.constant 0 : index
      %167 = vector.load %arg9[%c72_80, %c0_81] : memref<80x128xbf16, #tpu.memory_space<vmem>>, vector<3x128xbf16>
      tpu.vector_store %arg9[%c72_80, %c0_81], %166 {strides = array<i32>} : memref<80x128xbf16, #tpu.memory_space<vmem>>, vector<3x128xbf16>,
    } else {
    }
    %cst_25 = arith.constant 0.000000e+00 : bf16
    %66 = vector.broadcast %cst_25 : bf16 to vector<64x128xbf16>
    %c5_26 = arith.constant 5 : index
    %c0_27 = arith.constant 0 : index
    %67 = vector.load %arg9[%c5_26, %c0_27] : memref<80x128xbf16, #tpu.memory_space<vmem>>, vector<64x128xbf16>
    %c0_28 = arith.constant 0 : index
    %c0_29 = arith.constant 0 : index
    %68 = vector.load %arg5[%c0_28, %c0_29] : memref<7x128xbf16, #tpu.memory_space<vmem>>, vector<1x128xbf16>
    %69 = vector.broadcast %68 : vector<1x128xbf16> to vector<64x128xbf16>
    %70 = arith.mulf %67, %69 : vector<64x128xbf16>
    %71 = arith.addf %66, %70 : vector<64x128xbf16>
    %c6 = arith.constant 6 : index
    %c0_30 = arith.constant 0 : index
    %72 = vector.load %arg9[%c6, %c0_30] : memref<80x128xbf16, #tpu.memory_space<vmem>>, vector<64x128xbf16>
    %c1_31 = arith.constant 1 : index
    %c0_32 = arith.constant 0 : index
    %73 = vector.load %arg5[%c1_31, %c0_32] : memref<7x128xbf16, #tpu.memory_space<vmem>>, vector<1x128xbf16>
    %74 = vector.broadcast %73 : vector<1x128xbf16> to vector<64x128xbf16>
    %75 = arith.mulf %72, %74 : vector<64x128xbf16>
    %76 = arith.addf %71, %75 : vector<64x128xbf16>
    %c7 = arith.constant 7 : index
    %c0_33 = arith.constant 0 : index
    %77 = vector.load %arg9[%c7, %c0_33] : memref<80x128xbf16, #tpu.memory_space<vmem>>, vector<64x128xbf16>
    %c2 = arith.constant 2 : index
    %c0_34 = arith.constant 0 : index
    %78 = vector.load %arg5[%c2, %c0_34] : memref<7x128xbf16, #tpu.memory_space<vmem>>, vector<1x128xbf16>
    %79 = vector.broadcast %78 : vector<1x128xbf16> to vector<64x128xbf16>
    %80 = arith.mulf %77, %79 : vector<64x128xbf16>
    %81 = arith.addf %76, %80 : vector<64x128xbf16>
    %c8_35 = arith.constant 8 : index
    %c0_36 = arith.constant 0 : index
    %82 = vector.load %arg9[%c8_35, %c0_36] : memref<80x128xbf16, #tpu.memory_space<vmem>>, vector<64x128xbf16>
    %c3 = arith.constant 3 : index
    %c0_37 = arith.constant 0 : index
    %83 = vector.load %arg5[%c3, %c0_37] : memref<7x128xbf16, #tpu.memory_space<vmem>>, vector<1x128xbf16>
    %84 = vector.broadcast %83 : vector<1x128xbf16> to vector<64x128xbf16>
    %85 = arith.mulf %82, %84 : vector<64x128xbf16>
    %86 = arith.addf %81, %85 : vector<64x128xbf16>
    %c9 = arith.constant 9 : index
    %c0_38 = arith.constant 0 : index
    %87 = vector.load %arg9[%c9, %c0_38] : memref<80x128xbf16, #tpu.memory_space<vmem>>, vector<64x128xbf16>
    %c4 = arith.constant 4 : index
    %c0_39 = arith.constant 0 : index
    %88 = vector.load %arg5[%c4, %c0_39] : memref<7x128xbf16, #tpu.memory_space<vmem>>, vector<1x128xbf16>
    %89 = vector.broadcast %88 : vector<1x128xbf16> to vector<64x128xbf16>
    %90 = arith.mulf %87, %89 : vector<64x128xbf16>
    %91 = arith.addf %86, %90 : vector<64x128xbf16>
    %c10 = arith.constant 10 : index
    %c0_40 = arith.constant 0 : index
    %92 = vector.load %arg9[%c10, %c0_40] : memref<80x128xbf16, #tpu.memory_space<vmem>>, vector<64x128xbf16>
    %c5_41 = arith.constant 5 : index
    %c0_42 = arith.constant 0 : index
    %93 = vector.load %arg5[%c5_41, %c0_42] : memref<7x128xbf16, #tpu.memory_space<vmem>>, vector<1x128xbf16>
    %94 = vector.broadcast %93 : vector<1x128xbf16> to vector<64x128xbf16>
    %95 = arith.mulf %92, %94 : vector<64x128xbf16>
    %96 = arith.addf %91, %95 : vector<64x128xbf16>
    %c11 = arith.constant 11 : index
    %c0_43 = arith.constant 0 : index
    %97 = vector.load %arg9[%c11, %c0_43] : memref<80x128xbf16, #tpu.memory_space<vmem>>, vector<64x128xbf16>
    %c6_44 = arith.constant 6 : index
    %c0_45 = arith.constant 0 : index
    %98 = vector.load %arg5[%c6_44, %c0_45] : memref<7x128xbf16, #tpu.memory_space<vmem>>, vector<1x128xbf16>
    %99 = vector.broadcast %98 : vector<1x128xbf16> to vector<64x128xbf16>
    %100 = arith.mulf %97, %99 : vector<64x128xbf16>
    %101 = arith.addf %96, %100 : vector<64x128xbf16>
    %102 = arith.extf %101 : vector<64x128xbf16> to vector<64x128xf32>
    %c2_46 = arith.constant 2 : index
    %c0_47 = arith.constant 0 : index
    %103 = vector.load %arg6[%c2_46, %c0_47] : memref<4x128xf32, #tpu.memory_space<vmem>>, vector<1x128xf32>
    %104 = vector.broadcast %103 : vector<1x128xf32> to vector<64x128xf32>
    %105 = arith.addf %102, %104 : vector<64x128xf32>
    %106 = arith.negf %105 : vector<64x128xf32>
    %107 = math.exp %106 : vector<64x128xf32>
    %cst_48 = arith.constant 1.000000e+00 : f32
    %108 = vector.broadcast %cst_48 : f32 to vector<64x128xf32>
    %109 = arith.addf %108, %107 : vector<64x128xf32>
    %110 = arith.divf %108, %109 : vector<64x128xf32>
    %111 = arith.mulf %105, %110 : vector<64x128xf32>
    %112 = arith.truncf %111 : vector<64x128xf32> to vector<64x128xbf16>
    %c0_49 = arith.constant 0 : index
    %c0_50 = arith.constant 0 : index
    %113 = vector.load %arg7[%c0_49, %c0_50] : memref<128x128xbf16, #tpu.memory_space<vmem>>, vector<128x128xbf16>
    %cst_51 = arith.constant dense<0.000000e+00> : vector<64x128xf32>
    %114 = tpu.matmul %112, %113, %cst_51 {dimension_numbers = #tpu.dot_dimension_numbers<[1], [0], [0], [1], [0, 0, 1, 1], [], []>} : vector<64x128xbf16>, vector<128x128xbf16>, vector<64x128xf32> -> vector<64x128xf32>
    %c3_52 = arith.constant 3 : index
    %c0_53 = arith.constant 0 : index
    %115 = vector.load %arg6[%c3_52, %c0_53] : memref<4x128xf32, #tpu.memory_space<vmem>>, vector<1x128xf32>
    %116 = vector.broadcast %115 : vector<1x128xf32> to vector<64x128xf32>
    %117 = arith.addf %114, %116 : vector<64x128xf32>
    %c0_54 = arith.constant 0 : index
    %c0_55 = arith.constant 0 : index
    %c0_56 = arith.constant 0 : index
    %118 = vector.load %arg8[%c0_54, %c0_55, %c0_56] : memref<1x64x128xf32, #tpu.memory_space<vmem>>, vector<1x64x128xf32>
    %119 = vector.shape_cast %118 : vector<1x64x128xf32> to vector<64x128xf32>
    %120 = vector.shape_cast %117 : vector<64x128xf32> to vector<1x64x128xf32>
    tpu.vector_store %arg8[%c0_54, %c0_55, %c0_56], %120 {strides = array<i32>} : memref<1x64x128xf32, #tpu.memory_space<vmem>>, vector<1x64x128xf32>,
    return
  }
  func.func @transform_0(%arg0: i32, %arg1: i32) -> (i32, i32, i32) {
    %c0_i32 = arith.constant 0 : i32
    %c0_i32_0 = arith.constant 0 : i32
    return %arg0, %arg1, %c0_i32 : i32, i32, i32
  }
  func.func @transform_2(%arg0: i32, %arg1: i32) -> (i32, i32) {
    %c0_i32 = arith.constant 0 : i32
    %c0_i32_0 = arith.constant 0 : i32
    %c0_i32_1 = arith.constant 0 : i32
    return %c0_i32, %c0_i32_0 : i32, i32
  }
  func.func @transform_3(%arg0: i32, %arg1: i32) -> (i32, i32) {
    %c0_i32 = arith.constant 0 : i32
    %c0_i32_0 = arith.constant 0 : i32
    %c0_i32_1 = arith.constant 0 : i32
    return %c0_i32, %c0_i32_0 : i32, i32
  }
  func.func @transform_4(%arg0: i32, %arg1: i32) -> (i32, i32) {
    %c0_i32 = arith.constant 0 : i32
    %c0_i32_0 = arith.constant 0 : i32
    %c0_i32_1 = arith.constant 0 : i32
    return %c0_i32, %c0_i32_0 : i32, i32
  }
  func.func @transform_5(%arg0: i32, %arg1: i32) -> (i32, i32) {
    %c0_i32 = arith.constant 0 : i32
    %c0_i32_0 = arith.constant 0 : i32
    %c0_i32_1 = arith.constant 0 : i32
    return %c0_i32, %c0_i32_0 : i32, i32
  }
  func.func @transform_6(%arg0: i32, %arg1: i32) -> (i32, i32, i32) {
    %c0_i32 = arith.constant 0 : i32
    %c0_i32_0 = arith.constant 0 : i32
    return %arg0, %arg1, %c0_i32 : i32, i32, i32
  }
}

</mosaic_0001>

<bundles_post_ra>
// kernel: tpu_custom_call.1
= control target key start
LH: loop header
LB: loop body
LE: loop exit
PB: predicated region body
PF: predicated region fallthrough
CT: control target
= control target key end

     0   :  { %s3438_s0 = inlined_call_operand.hbm [shape: f32[2,200,128], index: 0, kind: input, shape index: {}]   ;;  %s3439_s1 = inlined_call_operand.hbm [shape: f32[2,200,128], index: 1, kind: input, shape index: {}]   ;;  %s3440_s2 = inlined_call_operand.hbm [shape: bf16[128,256], index: 2, kind: input, shape index: {}]   ;;  %s3441_s3 = inlined_call_operand.vmem [shape: bf16[7,128], index: 3, kind: input, shape index: {}]   ;;  %s3442_s4 = inlined_call_operand.vmem [shape: f32[4,128], index: 4, kind: input, shape index: {}]   ;;  %s3443_s5 = inlined_call_operand.hbm [shape: bf16[128,128], index: 5, kind: input, shape index: {}]   ;;  %s3444_s6 = inlined_call_operand.hbm [shape: f32[2,200,128], index: 6, kind: output, shape index: {}]  }
   0x1   :  { %3457 = sst [smem:[#allocation29_spill]] %s3444_s6 }
   0x2   :  { %11 = vsyncpa [#allocation6], 0 }
   0x3   :  { %13 = vsyncpa [#allocation6 + $0x1], 0 }
   0x4   :  { %14 = vsyncpa [#allocation9], 0 }
   0x5   :  { %15 = vsyncpa [#allocation7], 0 }
   0x6   :  { %17 = vsyncpa [#allocation7 + $0x1], 0  ;;  %s2728_s21 = smov 0   ;;  %s2730_s22 = smov 0  }
   0x7   :  { %s2732_s23 = smov 0   ;;  %s2734_s24 = smov 0  }
   0x8   :  { %s2736_s25 = smov 0   ;;  %s2738_s26 = smov 0  }
   0x9   :  { %s2740_s27 = smov 0   ;;  %s2742_s28 = smov 0  }
   0xa LB: > { %3458 = sst [smem:[#allocation23_spill]] %s2646_s21  ;;  %s1945_s29 = sadd.s32 4294967295, %s2674_s28   ;;  %s2674_s28 = sphi %s2742_s28, %s23_s28   ;;  %s2670_s27 = sphi %s2740_s27, %s3498_s27   ;;  %s2666_s26 = sphi %s2738_s26, %s3497_s26   ;;  %s2662_s25 = sphi %s2736_s25, %s3496_s25   ;;  %s2658_s24 = sphi %s2734_s24, %s3495_s24   ;;  %s2654_s23 = sphi %s2732_s23, %s3494_s23   ;;  %s2650_s22 = sphi %s2730_s22, %s3493_s22   ;;  %s2646_s21 = sphi %s2728_s21, %s3492_s21  }
   0xb   : > { %s1946_s30 = sadd.s32 4294967294, %s2674_s28   ;;  %s32_s7 = sadd.s32 1, %s2666_s26 }
   0xc   : > { %s35_s8 = sadd.s32 1, %s2670_s27  ;;  %p33_p0 = scmp.ge.s32.totalorder %s32_s7, 4 }
   0xd   : > { %s44_s9 = sadd.s32 1, %s2654_s23  ;;  %p51_p1 = scmp.ne.s32.totalorder %s2654_s23, %s2650_s22 }
   0xe   : > { %p52_p2 = scmp.eq.s32.totalorder %s2674_s28, 0  ;;  %s3500_s7 = smov (%p33_p0, %s32_s7), 0 }
   0xf   : > { %3459 = sst [smem:[#allocation24_spill]] %s3500_s7  ;;  %s3502_s8 = smov (!%p33_p0, %s35_s8), %s2670_s27 }
  0x10   : > { %s40_s10 = ssub.s32 %s2666_s26, %s3500_s7  ;;  %p2781_p3 = por %p52_p2, %p51_p1 }
  0x11   : > { %p37_p4 = scmp.ge.s32.totalorder %s3502_s8, 2  ;;  %p57_p5 = scmp.ne.s32.totalorder %s2650_s22, %s2646_s21 }
  0x12   : > { %s3460_s11 = scalar_select %p2781_p3, 1, 0 }
  0x13   : > { %p2787_p6 = scmp.eq.s32.totalorder %s1945_s29, 0  ;;  %p167_p7 = scmp.eq.s32.totalorder %s1945_s29, 7 }
  0x14   : > { %s3504_s8 = smov (%p37_p4, %s3502_s8), 0  ;;  %p173_p10 = scmp.eq.s32.totalorder %s1946_s30, 7 }
  0x15   : > { %s3461_s12 = scalar_select %p2787_p6, 1, 0 }
  0x16   : > { %3462 = sst [smem:[#allocation25_spill]] %s3504_s8  ;;  %p2795_p8 = por %p2787_p6, %p57_p5 }
  0x17   : > { %p2799_p9 = por %p167_p7, %p51_p1  ;;  %s39_s15 = ssub.s32 %s2670_s27, %s3504_s8 }
  0x18   : > { %s3463_s13 = scalar_select %p2795_p8, 1, 0 }
  0x19   : > { %s3464_s14 = scalar_select %p2799_p9, 1, 0 }
  0x1a   : > { %s41_s16 = sor.u32 %s40_s10, %s39_s15  ;;  %p1947_p11 = scmp.ge.s32.totalorder %s2674_s28, 1 }
  0x1b   : > { %3465 = sst [smem:[#allocation26_spill]] %s3464_s14  ;;  %p42_p12 = scmp.eq.s32.totalorder %s41_s16, 0 }
  0x1c   : > { %p2806_p13 = por %p173_p10, %p57_p5  ;;  %p180_p0 = scmp.lt.s32.totalorder %s2674_s28, 9 }
  0x1d   : > { %s2812_s18 = scalar_select %p42_p12, %s2654_s23, %s44_s9  }
  0x1e   : > { %s3466_s17 = scalar_select %p2806_p13, 1, 0 }
  0x1f   : > { %3468 = sst [smem:[#allocation28_spill]] %s2812_s18  ;;  %p2814_p2 = pnand %p1947_p11, %p180_p0 }
  0x20   : > { %3467 = sst [smem:[#allocation27_spill]] %s3466_s17  ;;  %s2676_s20 = smov [#allocation8]  }
  0x21   : > { %s3469_s19 = scalar_select %p2814_p2, 1, 0 }
  0x22   : > { %s192_s29 = sshll.u32 %s2676_s20, 4  ;;  %p2154_p1 = pneg %p2814_p2  ;;  %s193_s29 = int_to_ptr.vmem [resolvable:$true] %s192_s29 }
  0x23   : > { %s2677_s10 = smov [#allocation10]   ;;  %s2427_s8 = scalar_lea.hbm %s3440_s2, 2048 }
  0x24   : > { %p2822_p4 = pnand %p2154_p1, %p2787_p6  ;;  %s211_s9 = sshll.u32 %s2677_s10, 4  ;;  %s2826_s9 = int_to_ptr.vmem [resolvable:$true] %s211_s9 }
  0x25   : > { %p2428_p5 = scmp.ne.s32.totalorder %s3440_s2, %s2427_s8  ;;  %p2434_p12 = scmp.lt.u32.totalorder %s2427_s8, %s3440_s2 }
  0x26   : > { %p2429_p7 = pneg %p2822_p4 }
  0x28   : > { %p2430_p10 = pnand %p2429_p7, %p2428_p5 }
  0x2a   : > { %p2431_p11 = pneg %p2430_p10 }
  0x2c   : > { %p2436_p0 = pnand %p2434_p12, %p2431_p11 }
  0x2e   : > { %2439 = shalt.err (!%p2436_p0)
}
  0x2f   : > { %s2440_s10 = scalar_lea.vmem %s193_s29, 2048  ;;  %p2448_p6 = scmp.lt.s32.totalorder %s193_s29, %s193_s29 }
  0x30   : > { %p2441_p1 = scmp.ne.s32.totalorder %s193_s29, %s2440_s10  ;;  %p2449_p8 = scmp.lt.s32.totalorder %s2440_s10, %s2440_s10 }
  0x32   : > { %p2443_p13 = pnand %p2441_p1, %p2429_p7  ;;  %p2450_p2 = por %p2449_p8, %p2448_p6 }
  0x34   : > { %p2444_p9 = pneg %p2443_p13 }
  0x36   : > { %p2451_p3 = pnand %p2450_p2, %p2444_p9 }
  0x38   : > { %2454 = shalt.err (!%p2451_p3)
}
  0x39   : > { %s2678_s7 = smov 128   ;;  %s2679_s15 = smov 8  }
  0x3a   : > { %2157 = dma.hbm_to_vmem [thread:$0]  (!%p2822_p4), %s3440_s2, 2048, %s193_s29, [#allocation9], %s2678_s7, %s2678_s7, %s2679_s15  }
  0x3b   : > { %s2455_s20 = scalar_lea.hbm %s3443_s5, 1024 }
  0x3c   : > { %p2456_p13 = scmp.ne.s32.totalorder %s3443_s5, %s2455_s20  ;;  %p2462_p8 = scmp.lt.u32.totalorder %s2455_s20, %s3443_s5 }
  0x3e   : > { %p2458_p3 = pnand %p2456_p13, %p2429_p7 }
  0x40   : > { %p2459_p6 = pneg %p2458_p3 }
  0x42   : > { %p2464_p9 = pnand %p2462_p8, %p2459_p6 }
  0x44   : > { %2467 = shalt.err (!%p2464_p9)
}
  0x45   : > { %s2468_s29 = scalar_lea.vmem %s2826_s9, 1024  ;;  %p2476_p11 = scmp.lt.s32.totalorder %s2826_s9, %s2826_s9 }
  0x46   : > { %p2469_p2 = scmp.ne.s32.totalorder %s2826_s9, %s2468_s29  ;;  %p2477_p12 = scmp.lt.s32.totalorder %s2468_s29, %s2468_s29 }
  0x48   : > { %p2471_p5 = pnand %p2469_p2, %p2429_p7  ;;  %p2478_p0 = por %p2477_p12, %p2476_p11 }
  0x4a   : > { %p2472_p10 = pneg %p2471_p5 }
  0x4c   : > { %p2479_p1 = pnand %p2478_p0, %p2472_p10 }
  0x4e   : > { %2482 = shalt.err (!%p2479_p1)
}
  0x4f   : > { %s2680_s6 = smov 64   ;;  %s2681_s21 = smov 4  }
  0x50   : > { %2160 = dma.hbm_to_vmem [thread:$0]  (!%p2822_p4), %s3443_s5, 1024, %s2826_s9, [#allocation9], %s2680_s6, %s2680_s6, %s2681_s21  }
  0x51   : > { %p1950_p13 = scmp.ge.s32.totalorder %s2674_s28, 8 }
  0x52   : > { %p3471_p7 = scmp.ne.s32.totalorder (!%p1950_p13), %s3460_s11, 0 }
  0x53   : > { %221 = sbr.rel (%p1950_p13) target bundleno = 127 (0x7f), region = 32 }
  0x5a   : > { %224 = sbr.rel (!%p3471_p7) target bundleno = 127 (0x7f), region = 36  ;;  %s225_s15 = sand.u32 (%p3471_p7), 1, %s2654_s23  }
  0x5b   : > { %s1952_s8 = sshll.u32 (%p3471_p7), %s2666_s26, 3  ;;  %s1951_s17 = sshll.u32 (%p3471_p7), %s225_s15, 6 }
  0x5c   : > { %s231_s18 = ssub.s32 (%p3471_p7), 25, %s1952_s8  ;;  %s2883_s20 = scalar_lea.sflag (%p3471_p7), [#allocation6], %s225_s15 }
  0x5d   : > { %p232_p3 = scmp.lt.s32.totalorder (%p3471_p7), %s231_s18, 8  ;;  %s229_s9 = scalar_lea.vmem (%p3471_p7), [#allocation5], %s1951_s17 }
  0x61   : > { %s3506_s18 = smov (!%p232_p3, %s231_s18), 8 }
  0x62   : > { %s2880_s16 = sshll.u32 %s3506_s18, 7 }
  0x63   : > { %s236_s30 = ssub.s32 1024, %s2880_s16 }
  0x64   : > { %237 = vsyncadd %s2883_s20, %s236_s30  ;;  %p1954_p4 = scmp.ne.s32.totalorder %s2880_s16, 0  ;;  %s2138_s11 = smul.u32 25, %s2670_s27 }
  0x65   : > { %s244_s10 = sshll.u32 %s229_s9, 4  ;;  %s2888_s10 = int_to_ptr.vmem [resolvable:$true] %s244_s10 }
  0x66   : > { %s240_s29 = sadd.s32 %s2138_s11, %s1952_s8  ;;  %s2487_s8 = scalar_lea.hbm %s3438_s0, 6400 }
  0x67   : > { %s1955_s6 = sshll.u32 %s240_s29, 7 }
  0x68   : > { %s2893_s7 = scalar_lea.hbm %s3438_s0, %s1955_s6 }
  0x69   : > { %s2483_s15 = scalar_lea.hbm %s2893_s7, %s2880_s16  ;;  %p2488_p2 = scmp.lt.u32.totalorder %s2893_s7, %s3438_s0 }
  0x6a   : > { %p2484_p6 = scmp.ne.s32.totalorder %s2893_s7, %s2483_s15  ;;  %p2489_p5 = scmp.lt.u32.totalorder %s2487_s8, %s2483_s15 }
  0x6b   : > { %p2491_p11 = scmp.lt.u32.totalorder %s2483_s15, %s2893_s7 }
  0x6c   : > { %p2485_p8 = pnand %p2484_p6, %p1954_p4  ;;  %p2490_p10 = por %p2489_p5, %p2488_p2 }
  0x6e   : > { %p2486_p9 = pneg %p2485_p8  ;;  %p2492_p12 = por %p2491_p11, %p2490_p10 }
  0x70   : > { %p2493_p0 = pnand %p2492_p12, %p2486_p9 }
  0x72   : > { %2496 = shalt.err (!%p2493_p0)
}
  0x73   : > { %s2497_s11 = scalar_lea.vmem %s2888_s10, %s2880_s16  ;;  %s2682_s29 = smov [#allocation5]  }
  0x74   : > { %p2498_p1 = scmp.ne.s32.totalorder %s2888_s10, %s2497_s11  ;;  %s2501_s6 = sshll.u32 %s2682_s29, 4  ;;  %s2502_s6 = int_to_ptr.vmem [resolvable:$false] %s2501_s6 }
  0x75   : > { %s2503_s21 = scalar_lea.vmem %s2502_s6, 2048  ;;  %p2504_p3 = scmp.lt.s32.totalorder %s2888_s10, %s2502_s6 }
  0x76   : > { %p2499_p13 = pnand %p2498_p1, %p1954_p4  ;;  %p2505_p6 = scmp.lt.s32.totalorder %s2503_s21, %s2497_s11 }
  0x78   : > { %p2500_p7 = pneg %p2499_p13  ;;  %p2506_p8 = por %p2505_p6, %p2504_p3 }
  0x7a   : > { %p2507_p2 = pnand %p2506_p8, %p2500_p7 }
  0x7c   : > { %2510 = shalt.err (!%p2507_p2)
}
  0x7d   : > { %s2683_s14 = smov 128   ;;  %s2684_s15 = smov 8  }
  0x7e   : > { %250 = dma.hbm_to_vmem [thread:$0]  (%p1954_p4), %s2893_s7, %s2880_s16, %s2888_s10, %s2883_s20, %s2683_s14, %s2683_s14, %s2684_s15  }
  0x7f PF: > { %p3472_p9 = scmp.ne.s32.totalorder %s3469_s19, 0 }
  0x80   : > { %s2923_s17 = sand.u32 (!%p3472_p9), 1, %s2650_s22   ;;  %p3473_p5 = scmp.ne.s32.totalorder (!%p3472_p9), %s3463_s13, 0 }
  0x81   : > { %256 = sbr.rel (%p3472_p9) target bundleno = 2215 (0x8a7), region = 40  ;;  %s3455_s18 = sshll.u32 (!%p3472_p9), %s2923_s17, 6 }
  0x82   : > { %s259_s8 = scalar_lea.sflag (!%p3472_p9), [#allocation6], %s2923_s17  ;;  %s262_s30 = scalar_lea.vmem (!%p3472_p9), [#allocation5], %s3455_s18 }
  0x88   : > { %2629 = dma.done.wait (%p3473_p5), %s259_s8, 1024  }
  0x89   : > { %2631 = vsyncadd (%p3473_p5), %s259_s8, 4294966272  ;;  %p3474_p4 = scmp.ne.s32.totalorder %s3461_s12, 0 }
  0x8b   : > { %2633 = dma.done.wait (%p3474_p4), [#allocation9], 3072  }
  0x8c   : > { %2635 = vsyncadd (%p3474_p4), [#allocation9], 4294964224  ;;  %vm353_vm0 = vcmask 1043458   ;;  %vm354_vm1 = vsmask.f32 7946  ;;  %vm359_vm2 = vcmask 1045508  }
  0x8d   : > { %vm360_vm3 = vsmask.f32 5376  ;;  %vm2937_vm4 = vmand %vm353_vm0, %vm354_vm1  ;;  %v356_v2 = vld [vmem:[#allocation2] sm:$0xc]  ;;  %v362_v3 = vld [vmem:[#allocation2 + $0x20] sm:$0x30] }
  0x8e   : > { %vm2942_vm5 = vmand %vm359_vm2, %vm360_vm3  ;;  %v365_v4 = vld [vmem:[%s262_s30] sm:$0xff]  ;;  %v357_v5 = vsel %vm2937_vm4, 0, %v356_v2  ;;  %v366_v8 = vld [vmem:[%s262_s30 + $0x8] sm:$0xff]  ;;  %v2685_v62 = vmov 0   ;;  %s2991_s12 = sshll.u32 %s2658_s24, 6  ;;  %s318_s16 = smul.u32 200, %s2662_s25 }
  0x8f   : > { %v363_v6 = vsel %vm2942_vm5, 0, %v362_v3  ;;  %373 = vadd.xlane.f32.xlu0 %v365_v4  ;;  %v369_v7 = vld [vmem:[%s262_s30 + $0x20] sm:$0xff]  ;;  %358 = vst [vmem:[#allocation2] sm:$0xc] %v357_v5  ;;  %v370_v9 = vld [vmem:[%s262_s30 + $0x28] sm:$0xff]  ;;  %v367_v10 = vld [vmem:[%s262_s30 + $0x10] sm:$0xff]  ;;  %594 = vmatprep.mubr.bf16.mxu0 %v2685_v62 }
  0x90   : > { %364 = vst [vmem:[#allocation2 + $0x20] sm:$0x30] %v363_v6  ;;  %381 = vadd.xlane.f32.xlu1 %v369_v7  ;;  %v368_v11 = vld [vmem:[%s262_s30 + $0x18] sm:$0xff]  ;;  %v371_v12 = vld [vmem:[%s262_s30 + $0x30] sm:$0xff]  ;;  %v2251_v14 = vld [vmem:[#allocation8 + $0x4] ss:$8 sps:$4 sm:$0xff]   ;;  %614 = vmatprep.mubr.bf16.mxu1 %v2685_v62 }
  0x91   : > { %v372_v13 = vld [vmem:[%s262_s30 + $0x38] sm:$0xff]  ;;  %v2253_v15 = vld [vmem:[#allocation8] ss:$8 sps:$4 sm:$0xff]   ;;  %562 = vmatprep.subr.bf16.mxu0 %v2251_v14  ;;  %2106 = vmatprep.subr.bf16.mxu1 %v2251_v14  ;;  %v2257_v18 = vld [vmem:[#allocation8 + $0x24] ss:$8 sps:$4 sm:$0xff]   ;;  %s2069_s13 = sadd.s32 64, %s2991_s12 }
  0x92   : > { %v2254_v16 = vld [vmem:[#allocation8 + $0x14] ss:$8 sps:$4 sm:$0xff]   ;;  %563 = vmatpush1.bf16.msra.mxu0 %v2253_v15  ;;  %2114 = vmatpush1.bf16.msra.mxu1 %v2253_v15  ;;  %v2256_v17 = vld [vmem:[#allocation8 + $0x10] ss:$8 sps:$4 sm:$0xff]   ;;  %v2259_v51 = vld [vmem:[#allocation8 + $0x20] ss:$8 sps:$4 sm:$0xff]  }
  0x93   : > { %375 = vadd.xlane.f32.xlu0 %v366_v8  ;;  %564 = vmatprep.subr.bf16.mxu0 %v2254_v16  ;;  %v2260_v52 = vld [vmem:[#allocation8 + $0x34] ss:$8 sps:$4 sm:$0xff]   ;;  %v2262_v53 = vld [vmem:[#allocation8 + $0x30] ss:$8 sps:$4 sm:$0xff]   ;;  %v2263_v54 = vld [vmem:[#allocation8 + $0x44] ss:$8 sps:$4 sm:$0xff]  }
  0x94   : > { %383 = vadd.xlane.f32.xlu1 %v370_v9  ;;  %2107 = vmatprep.subr.bf16.mxu1 %v2254_v16  ;;  %v2265_v55 = vld [vmem:[#allocation8 + $0x40] ss:$8 sps:$4 sm:$0xff]   ;;  %v2266_v56 = vld [vmem:[#allocation8 + $0x54] ss:$8 sps:$4 sm:$0xff]   ;;  %v2268_v57 = vld [vmem:[#allocation8 + $0x50] ss:$8 sps:$4 sm:$0xff]  }
  0x95   : > { %v2269_v58 = vld [vmem:[#allocation8 + $0x64] ss:$8 sps:$4 sm:$0xff]   ;;  %v2271_v59 = vld [vmem:[#allocation8 + $0x60] ss:$8 sps:$4 sm:$0xff]   ;;  %v2272_v60 = vld [vmem:[#allocation8 + $0x74] ss:$8 sps:$4 sm:$0xff]  }
  0x96   : > { %565 = vmatpush1.bf16.msra.mxu0 %v2256_v17  ;;  %2115 = vmatpush1.bf16.msra.mxu1 %v2256_v17  ;;  %v2274_v61 = vld [vmem:[#allocation8 + $0x70] ss:$8 sps:$4 sm:$0xff]   ;;  %s1966_s19 = sadd.s32 4294967293, %s2991_s12  ;;  %p2169_p11 = scmp.gt.s32.totalorder %s2658_s24, 0 }
  0x97   : > { %377 = vadd.xlane.f32.xlu0 %v367_v10  ;;  %566 = vmatprep.subr.bf16.mxu0 %v2257_v18  ;;  %s319_s20 = sadd.s32 %s1966_s19, %s318_s16  ;;  %s2686_s10 = smov [#allocation3]  }
  0x98   : > { %379 = vadd.xlane.f32.xlu1 %v368_v11  ;;  %2108 = vmatprep.subr.bf16.mxu1 %v2257_v18  ;;  %s329_s7 = sshll.u32 %s2686_s10, 4  ;;  %s1967_s9 = sshll.u32 %s319_s20, 4  ;;  %s3000_s7 = int_to_ptr.vmem [resolvable:$true] %s329_s7 }
  0x99   : > { %s321_s6 = scalar_lea.hbm %s3439_s1, %s1967_s9  ;;  %s3005_s21 = sadd.s32 3, %s2069_s13 }
  0x9a   : > { %567 = vmatpush1.bf16.msra.mxu0 %v2259_v51  ;;  %2116 = vmatpush1.bf16.msra.mxu1 %v2259_v51  ;;  %s2511_s14 = scalar_lea.hbm %s321_s6, 48  ;;  %s2515_s30 = scalar_lea.hbm %s3439_s1, 6400 }
  0x9b   : > { %385 = vadd.xlane.f32.xlu0 %v371_v12  ;;  %568 = vmatprep.subr.bf16.mxu0 %v2260_v52  ;;  %p2512_p12 = scmp.ne.s32.totalorder %s321_s6, %s2511_s14  ;;  %p2516_p13 = scmp.lt.u32.totalorder %s321_s6, %s3439_s1 }
  0x9c   : > { %387 = vadd.xlane.f32.xlu1 %v372_v13  ;;  %2109 = vmatprep.subr.bf16.mxu1 %v2260_v52  ;;  %p2517_p7 = scmp.lt.u32.totalorder %s2515_s30, %s2511_s14  ;;  %p2519_p6 = scmp.lt.u32.totalorder %s2511_s14, %s321_s6 }
  0x9d   : > { %p2513_p0 = pnand %p2512_p12, %p2169_p11 }
  0x9e   : > { %569 = vmatpush1.bf16.msra.mxu0 %v2262_v53  ;;  %2117 = vmatpush1.bf16.msra.mxu1 %v2262_v53  ;;  %p2518_p3 = por %p2517_p7, %p2516_p13 }
  0x9f   : > { %570 = vmatprep.subr.bf16.mxu0 %v2263_v54  ;;  %2110 = vmatprep.subr.bf16.mxu1 %v2263_v54  ;;  %p2514_p1 = pneg %p2513_p0 }
  0xa0   : > { %p2520_p8 = por %p2519_p6, %p2518_p3 }
  0xa2   : > { %571 = vmatpush1.bf16.msra.mxu0 %v2265_v55  ;;  %2118 = vmatpush1.bf16.msra.mxu1 %v2265_v55  ;;  %p2521_p2 = pnand %p2520_p8, %p2514_p1 }
  0xa3   : > { %572 = vmatprep.subr.bf16.mxu0 %v2266_v56  ;;  %2111 = vmatprep.subr.bf16.mxu1 %v2266_v56 }
  0xa6   : > { %573 = vmatpush1.bf16.msra.mxu0 %v2268_v57  ;;  %2119 = vmatpush1.bf16.msra.mxu1 %v2268_v57 }
  0xa7   : > { %574 = vmatprep.subr.bf16.mxu0 %v2269_v58  ;;  %2112 = vmatprep.subr.bf16.mxu1 %v2269_v58 }
  0xaa   : > { %575 = vmatpush1.bf16.msra.mxu0 %v2271_v59  ;;  %2120 = vmatpush1.bf16.msra.mxu1 %v2271_v59 }
  0xab   : > { %576 = vmatprep.subr.bf16.mxu0 %v2272_v60  ;;  %2113 = vmatprep.subr.bf16.mxu1 %v2272_v60 }
  0xae   : > { %577 = vmatpush1.bf16.msra.mxu0 %v2274_v61  ;;  %2121 = vmatpush1.bf16.msra.mxu1 %v2274_v61 }
 0x11c   : > { %v374_v19 = vpop.xlane.xlu0 %373 }
 0x11d   : > { %v390_v20 = vmul.f32 0.0078125, %v374_v19  ;;  %v382_v21 = vpop.xlane.xlu1 %381 }
 0x11e   : > { %v394_v22 = vmul.f32 0.0078125, %v382_v21 }
 0x11f   : > { %v2950_v23 = vsub.f32 %v365_v4, %v390_v20 }
 0x120   : > { %v2952_v24 = vsub.f32 %v369_v7, %v394_v22  ;;  %v376_v25 = vpop.xlane.xlu0 %375 }
 0x121   : > { %v391_v26 = vmul.f32 0.0078125, %v376_v25  ;;  %v406_v27 = vmul.f32 %v2950_v23, %v2950_v23  ;;  %v384_v28 = vpop.xlane.xlu1 %383 }
 0x122   : > { %v395_v29 = vmul.f32 0.0078125, %v384_v28  ;;  %v410_v31 = vmul.f32 %v2952_v24, %v2952_v24 }
 0x123   : > { %v2956_v30 = vsub.f32 %v366_v8, %v391_v26  ;;  %414 = vadd.xlane.f32.xlu0 %v406_v27 }
 0x124   : > { %v2960_v32 = vsub.f32 %v370_v9, %v395_v29  ;;  %v378_v33 = vpop.xlane.xlu0 %377 }
 0x125   : > { %v392_v34 = vmul.f32 0.0078125, %v378_v33  ;;  %v407_v35 = vmul.f32 %v2956_v30, %v2956_v30  ;;  %v380_v36 = vpop.xlane.xlu1 %379 }
 0x126   : > { %v393_v37 = vmul.f32 0.0078125, %v380_v36  ;;  %v411_v39 = vmul.f32 %v2960_v32, %v2960_v32 }
 0x127   : > { %v2964_v38 = vsub.f32 %v367_v10, %v392_v34  ;;  %422 = vadd.xlane.f32.xlu0 %v410_v31  ;;  %416 = vadd.xlane.f32.xlu1 %v407_v35 }
 0x128   : > { %v2968_v40 = vsub.f32 %v368_v11, %v393_v37  ;;  %v386_v41 = vpop.xlane.xlu0 %385 }
 0x129   : > { %v396_v42 = vmul.f32 0.0078125, %v386_v41  ;;  %v408_v43 = vmul.f32 %v2964_v38, %v2964_v38  ;;  %v388_v44 = vpop.xlane.xlu1 %387 }
 0x12a   : > { %v397_v45 = vmul.f32 0.0078125, %v388_v44  ;;  %v409_v47 = vmul.f32 %v2968_v40, %v2968_v40 }
 0x12b   : > { %v2972_v46 = vsub.f32 %v371_v12, %v396_v42  ;;  %424 = vadd.xlane.f32.xlu1 %v411_v39  ;;  %418 = vadd.xlane.f32.xlu0 %v408_v43 }
 0x12c   : > { %v2976_v48 = vsub.f32 %v372_v13, %v397_v45 }
 0x12d   : > { %v412_v49 = vmul.f32 %v2972_v46, %v2972_v46 }
 0x12e   : > { %v413_v50 = vmul.f32 %v2976_v48, %v2976_v48 }
 0x12f   : > { %420 = vadd.xlane.f32.xlu1 %v409_v47  ;;  %426 = vadd.xlane.f32.xlu0 %v412_v49 }
 0x133   : > { %428 = vadd.xlane.f32.xlu1 %v413_v50 }
 0x1b0   : > { %v415_v63 = vpop.xlane.xlu0 %414 }
 0x1b1   : > { %v430_v2 = vmul.f32 0.0078125, %v415_v63 }
 0x1b3   : > { %v438_v3 = vadd.f32 1e-05, %v430_v2 }
 0x1b4   : > { %v417_v4 = vpop.xlane.xlu1 %416  ;;  %v423_v5 = vpop.xlane.xlu0 %422 }
 0x1b5   : > { %v431_v6 = vmul.f32 0.0078125, %v417_v4  ;;  %v434_v7 = vmul.f32 0.0078125, %v423_v5  ;;  %2275 = vrsqrt.f32 %v438_v3 }
 0x1b7   : > { %v439_v8 = vadd.f32 1e-05, %v431_v6  ;;  %v442_v9 = vadd.f32 1e-05, %v434_v7 }
 0x1b8   : > { %v425_v10 = vpop.xlane.xlu1 %424  ;;  %v419_v11 = vpop.xlane.xlu0 %418 }
 0x1b9   : > { %2277 = vrsqrt.f32 %v439_v8  ;;  %v435_v12 = vmul.f32 0.0078125, %v425_v10  ;;  %v432_v13 = vmul.f32 0.0078125, %v419_v11 }
 0x1ba   : > { %2279 = vrsqrt.f32 %v442_v9 }
 0x1bb   : > { %v443_v14 = vadd.f32 1e-05, %v435_v12  ;;  %v440_v15 = vadd.f32 1e-05, %v432_v13 }
 0x1bc   : > { %v421_v16 = vpop.xlane.xlu1 %420  ;;  %v427_v17 = vpop.xlane.xlu0 %426 }
 0x1bd   : > { %2281 = vrsqrt.f32 %v443_v14  ;;  %v433_v18 = vmul.f32 0.0078125, %v421_v16  ;;  %v436_v19 = vmul.f32 0.0078125, %v427_v17 }
 0x1be   : > { %2283 = vrsqrt.f32 %v440_v15 }
 0x1bf   : > { %v441_v20 = vadd.f32 1e-05, %v433_v18  ;;  %v444_v21 = vadd.f32 1e-05, %v436_v19  ;;  %v2276_v25 = vpop.eup %2275 }
 0x1c0   : > { %v429_v22 = vpop.xlane.xlu1 %428  ;;  %v454_v29 = vmul.f32 %v2276_v25, %v2950_v23 }
 0x1c1   : > { %2285 = vrsqrt.f32 %v441_v20  ;;  %v437_v26 = vmul.f32 0.0078125, %v429_v22 }
 0x1c2   : > { %2287 = vrsqrt.f32 %v444_v21 }
 0x1c3   : > { %v2278_v27 = vpop.eup %2277  ;;  %v445_v28 = vadd.f32 1e-05, %v437_v26 }
 0x1c4   : > { %v455_v31 = vmul.f32 %v2278_v27, %v2956_v30  ;;  %v2280_v33 = vpop.eup %2279 }
 0x1c5   : > { %2289 = vrsqrt.f32 %v445_v28  ;;  %v458_v36 = vmul.f32 %v2280_v33, %v2952_v24 }
 0x1c6   : > { %v462_v34 = vpack.c.bf16 %v455_v31, %v454_v29 }
 0x1c7   : > { %v2282_v35 = vpop.eup %2281 }
 0x1c8   : > { %595 = vmatmul.mubr.bf16.vlgmr.msra.gmra.mrb[0].mxu0 %v462_v34  ;;  %v459_v37 = vmul.f32 %v2282_v35, %v2960_v32  ;;  %v2284_v39 = vpop.eup %2283 }
 0x1c9   : > { %604 = vmatprep.mubr.bf16.mxu0 %v2685_v62  ;;  %v456_v23 = vmul.f32 %v2284_v39, %v2964_v38 }
 0x1ca   : > { %v464_v41 = vpack.c.bf16 %v459_v37, %v458_v36 }
 0x1cb   : > { %v2286_v42 = vpop.eup %2285 }
 0x1cc   : > { %615 = vmatmul.mubr.bf16.vlgmr.msra.gmra.mrb[0].mxu1 %v464_v41  ;;  %v457_v30 = vmul.f32 %v2286_v42, %v2968_v40  ;;  %v2288_v43 = vpop.eup %2287 }
 0x1cd   : > { %624 = vmatprep.mubr.bf16.mxu1 %v2685_v62  ;;  %v460_v32 = vmul.f32 %v2288_v43, %v2972_v46 }
 0x1ce   : > { %v463_v44 = vpack.c.bf16 %v457_v30, %v456_v23 }
 0x1cf   : > { %v2290_v24 = vpop.eup %2289 }
 0x1d0   : > { %605 = vmatmul.mubr.bf16.gmra.mrb[4].mxu0 %v463_v44  ;;  %v461_v45 = vmul.f32 %v2290_v24, %v2976_v48 }
 0x1d2   : > { %v465_v47 = vpack.c.bf16 %v461_v45, %v460_v32 }
 0x1d4   : > { %625 = vmatmul.mubr.bf16.gmra.mrb[4].mxu1 %v465_v47 }
 0x1d5   : > { %2524 = shalt.err (!%p2521_p2)  }
 0x1d6   : > { %s2525_s13 = scalar_lea.vmem %s3000_s7, 48  ;;  %s3456_s9 = scalar_lea.vmem %s3000_s7, 128 }
 0x1d7   : > { %p2526_p9 = scmp.ne.s32.totalorder %s3000_s7, %s2525_s13  ;;  %p2532_p12 = scmp.lt.s32.totalorder %s3000_s7, %s3000_s7 }
 0x1d8   : > { %p2533_p0 = scmp.lt.s32.totalorder %s3456_s9, %s2525_s13 }
 0x1d9   : > { %p2527_p5 = pnand %p2526_p9, %p2169_p11 }
 0x1da   : > { %p2534_p13 = por %p2533_p0, %p2532_p12 }
 0x1db   : > { %p2528_p4 = pneg %p2527_p5 }
 0x1dd   : > { %p2535_p7 = pnand %p2534_p13, %p2528_p4 }
 0x1df   : > { %2538 = shalt.err (!%p2535_p7)  }
 0x1e0   : > { %2150 = dma.hbm_to_vmem [thread:$0]  (%p2169_p11), %s321_s6, 48, %s3000_s7, [#allocation4] }
 0x1e1   : > { %p2170_p3 = scmp.le.s32.totalorder %s3005_s21, 200  ;;  %s1877_s18 = sadd.s32 %s2991_s12, %s318_s16 }
 0x1e2   : > { %s1970_s11 = sshll.u32 %s1877_s18, 4  ;;  %s2687_s29 = smov [#allocation3 + $0x4]  }
 0x1e3   : > { %s349_s14 = sshll.u32 %s2687_s29, 4  ;;  %s1879_s19 = scalar_lea.hbm %s3439_s1, %s1970_s11  ;;  %s350_s14 = int_to_ptr.vmem [resolvable:$true] %s349_s14 }
 0x1e4   : > { %s1880_s10 = scalar_lea.hbm %s1879_s19, 1024  ;;  %s2567_s20 = scalar_lea.hbm %s1879_s19, 1072 }
 0x1e5   : > { %p2540_p6 = scmp.ne.s32.totalorder %s1880_s10, %s2567_s20  ;;  %p2544_p11 = scmp.lt.u32.totalorder %s1880_s10, %s3439_s1 }
 0x1e6   : > { %p2545_p9 = scmp.lt.u32.totalorder %s2515_s30, %s2567_s20  ;;  %p2547_p4 = scmp.lt.u32.totalorder %s2567_s20, %s1880_s10 }
 0x1e7   : > { %p2541_p8 = pnand %p2540_p6, %p2170_p3 }
 0x1e8   : > { %p2546_p5 = por %p2545_p9, %p2544_p11 }
 0x1e9   : > { %p2542_p2 = pneg %p2541_p8 }
 0x1ea   : > { %p2548_p12 = por %p2547_p4, %p2546_p5 }
 0x1ec   : > { %p2549_p0 = pnand %p2548_p12, %p2542_p2 }
 0x1ee   : > { %2552 = shalt.err (!%p2549_p0)  }
 0x1ef   : > { %s2553_s18 = scalar_lea.vmem %s350_s14, 48  ;;  %p2560_p8 = scmp.lt.s32.totalorder %s350_s14, %s3000_s7 }
 0x1f0   : > { %p2554_p13 = scmp.ne.s32.totalorder %s350_s14, %s2553_s18  ;;  %s3479_s11 = scalar_lea.vmem %s3000_s7, 128 }
 0x1f1   : > { %p2561_p1 = scmp.lt.s32.totalorder %s3479_s11, %s2553_s18 }
 0x1f2   : > { %p2555_p7 = pnand %p2554_p13, %p2170_p3 }
 0x1f3   : > { %p2562_p10 = por %p2561_p1, %p2560_p8 }
 0x1f4   : > { %p2556_p6 = pneg %p2555_p7 }
 0x1f6   : > { %p2563_p9 = pnand %p2562_p10, %p2556_p6 }
 0x1f8   : > { %2566 = shalt.err (!%p2563_p9)  }
 0x1f9   : > { %2152 = dma.hbm_to_vmem [thread:$0]  (%p2170_p3), %s1880_s10, 48, %s350_s14, [#allocation4 + $0x1]  ;;  %v1988_v38 = vld [vmem:[%s3442_s4 + $0x1] ss:$0 sm:$0xff]  ;;  %v717_v12 = vlaneseq  ;;  %v727_v26 = vstv %s2991_s12  ;;  %v3082_v34 = vld [vmem:[%s3442_s4] ss:$0 sm:$0xff] }
 0x1fa   : > { %vm776_vm14 = vcmask 1043456   ;;  %s3480_s12 = sshll.u32 %s2923_s17, 6  ;;  %p3481_p10 = scmp.le.s32.totalorder %s2658_s24, 0 }
 0x1fb   : > { %v3074_v20 = vshrl.u32 %v717_v12, 7  ;;  %s3110_s14 = scalar_lea.vmem [#allocation11], %s3480_s12 }
 0x1fd   : > { %v719_v28 = vadd.s32 8, %v3074_v20  ;;  %v728_v33 = vadd.s32 %v727_v26, %v3074_v20  ;;  %v722_v36 = vadd.s32 32, %v3074_v20  ;;  %v723_v42 = vadd.s32 40, %v3074_v20 }
 0x1fe   : > { %v720_v24 = vadd.s32 16, %v3074_v20 }
 0x1ff   : > { %v729_v39 = vadd.s32 %v727_v26, %v719_v28  ;;  %vm736_vm6 = vcmp.lt.s32.totalorder %v728_v33, 200  ;;  %v732_v32 = vadd.s32 %v727_v26, %v722_v36 }
 0x201   : > { %vm737_vm7 = vcmp.lt.s32.totalorder %v729_v39, 200  ;;  %vm740_vm8 = vcmp.lt.s32.totalorder %v732_v32, 200 }
 0x29b   : > { %v3058_v40 = vpop.f32.mrb[0].mxu0 }
 0x29c   : > { %v598_v46 = vpop.f32.mrb[1].mxu0  ;;  %v640_v30 = vadd.f32 %v3082_v34, %v3058_v40 }
 0x29d   : > { %v653_v48 = vadd.f32 %v1988_v38, %v598_v46  ;;  %v3060_v49 = vpop.f32.mrb[2].mxu0 }
 0x29e   : > { %v602_v50 = vpop.f32.mrb[3].mxu0 }
 0x29f   : > { %v1989_v51 = vmul.f32 -1.442695, %v653_v48  ;;  %v654_v52 = vadd.f32 %v1988_v38, %v602_v50  ;;  %v3062_v53 = vpop.f32.mrb[0].mxu1  ;;  %v721_v50 = vadd.s32 24, %v3074_v20 }
 0x2a0   : > { %v618_v54 = vpop.f32.mrb[1].mxu1 }
 0x2a1   : > { %2291 = vpow2.f32 %v1989_v51  ;;  %v1990_v55 = vmul.f32 -1.442695, %v654_v52  ;;  %v657_v56 = vadd.f32 %v1988_v38, %v618_v54  ;;  %v3064_v57 = vpop.f32.mrb[2].mxu1  ;;  %v733_v51 = vadd.s32 %v727_v26, %v723_v42 }
 0x2a2   : > { %v622_v58 = vpop.f32.mrb[3].mxu1  ;;  %v644_v52 = vadd.f32 %v3082_v34, %v3062_v53 }
 0x2a3   : > { %2293 = vpow2.f32 %v1990_v55  ;;  %v1993_v59 = vmul.f32 -1.442695, %v657_v56  ;;  %v658_v60 = vadd.f32 %v1988_v38, %v622_v58  ;;  %v3066_v61 = vpop.f32.mrb[4].mxu0  ;;  %v724_v56 = vadd.s32 48, %v3074_v20 }
 0x2a4   : > { %v608_v62 = vpop.f32.mrb[5].mxu0  ;;  %v730_v58 = vadd.s32 %v727_v26, %v720_v24  ;;  %vm741_vm9 = vcmp.lt.s32.totalorder %v733_v51, 200 }
 0x2a5   : > { %2295 = vpow2.f32 %v1993_v59  ;;  %v1994_v63 = vmul.f32 -1.442695, %v658_v60  ;;  %v655_v2 = vadd.f32 %v1988_v38, %v608_v62  ;;  %v3068_v3 = vpop.f32.mrb[6].mxu0  ;;  %v645_v59 = vadd.f32 %v3082_v34, %v3064_v57 }
 0x2a6   : > { %v612_v4 = vpop.f32.mrb[7].mxu0  ;;  %vm738_vm10 = vcmp.lt.s32.totalorder %v730_v58, 200  ;;  %v643_v57 = vadd.f32 %v3082_v34, %v3068_v3 }
 0x2a7   : > { %2297 = vpow2.f32 %v1994_v63  ;;  %v1991_v5 = vmul.f32 -1.442695, %v655_v2  ;;  %v656_v6 = vadd.f32 %v1988_v38, %v612_v4  ;;  %v3070_v7 = vpop.f32.mrb[4].mxu1  ;;  %v725_v63 = vadd.s32 56, %v3074_v20 }
 0x2a8   : > { %v628_v8 = vpop.f32.mrb[5].mxu1  ;;  %v731_v2 = vadd.s32 %v727_v26, %v721_v50 }
 0x2a9   : > { %2299 = vpow2.f32 %v1991_v5  ;;  %v1992_v9 = vmul.f32 -1.442695, %v656_v6  ;;  %v659_v10 = vadd.f32 %v1988_v38, %v628_v8  ;;  %v3072_v11 = vpop.f32.mrb[6].mxu1  ;;  %v642_v5 = vadd.f32 %v3082_v34, %v3066_v61 }
 0x2aa   : > { %v632_v13 = vpop.f32.mrb[7].mxu1  ;;  %vm739_vm11 = vcmp.lt.s32.totalorder %v731_v2, 200 }
 0x2ab   : > { %v2292_v14 = vpop.eup %2291  ;;  %2301 = vpow2.f32 %v1992_v9  ;;  %v1995_v15 = vmul.f32 -1.442695, %v659_v10  ;;  %v660_v16 = vadd.f32 %v1988_v38, %v632_v13  ;;  %v641_v38 = vadd.f32 %v3082_v34, %v3060_v49 }
 0x2ac   : > { %v685_v17 = vadd.f32 1.0, %v2292_v14  ;;  %v734_v9 = vadd.s32 %v727_v26, %v724_v56 }
 0x2ad   : > { %v2294_v18 = vpop.eup %2293  ;;  %2303 = vpow2.f32 %v1995_v15  ;;  %v1996_v19 = vmul.f32 -1.442695, %v660_v16  ;;  %v735_v15 = vadd.s32 %v727_v26, %v725_v63 }
 0x2ae   : > { %2305 = vrcp.f32 %v685_v17  ;;  %v686_v21 = vadd.f32 1.0, %v2294_v18  ;;  %v646_v18 = vadd.f32 %v3082_v34, %v3070_v7  ;;  %vm742_vm12 = vcmp.lt.s32.totalorder %v734_v9, 200 }
 0x2af   : > { %v2296_v22 = vpop.eup %2295  ;;  %2307 = vpow2.f32 %v1996_v19  ;;  %vm743_vm13 = vcmp.lt.s32.totalorder %v735_v15, 200 }
 0x2b0   : > { %2309 = vrcp.f32 %v686_v21  ;;  %v689_v25 = vadd.f32 1.0, %v2296_v22  ;;  %v647_v22 = vadd.f32 %v3082_v34, %v3072_v11 }
 0x2b1   : > { %v2298_v27 = vpop.eup %2297 }
 0x2b2   : > { %2311 = vrcp.f32 %v689_v25  ;;  %v690_v29 = vadd.f32 1.0, %v2298_v27 }
 0x2b3   : > { %v2300_v31 = vpop.eup %2299 }
 0x2b4   : > { %2313 = vrcp.f32 %v690_v29  ;;  %v687_v35 = vadd.f32 1.0, %v2300_v31 }
 0x2b5   : > { %v2302_v37 = vpop.eup %2301 }
 0x2b6   : > { %2315 = vrcp.f32 %v687_v35  ;;  %v688_v41 = vadd.f32 1.0, %v2302_v37 }
 0x2b7   : > { %v2304_v23 = vpop.eup %2303 }
 0x2b8   : > { %v2306_v43 = vpop.eup %2305  ;;  %2317 = vrcp.f32 %v688_v41  ;;  %v691_v44 = vadd.f32 1.0, %v2304_v23 }
 0x2b9   : > { %v2308_v45 = vpop.eup %2307  ;;  %v709_v47 = vmul.f32 %v2306_v43, %v640_v30 }
 0x2ba   : > { %v2310_v46 = vpop.eup %2309  ;;  %2319 = vrcp.f32 %v691_v44  ;;  %v692_v48 = vadd.f32 1.0, %v2308_v45 }
 0x2bb   : > { %v710_v40 = vmul.f32 %v2310_v46, %v641_v38  ;;  %v760_v54 = vsel %vm736_vm6, %v709_v47, 0.0 }
 0x2bc   : > { %v2312_v55 = vpop.eup %2311  ;;  %2321 = vrcp.f32 %v692_v48 }
 0x2bd   : > { %v713_v49 = vmul.f32 %v2312_v55, %v644_v52  ;;  %v761_v60 = vsel %vm737_vm7, %v710_v40, 0.0 }
 0x2be   : > { %v2314_v62 = vpop.eup %2313  ;;  %v768_v53 = vpack.c.bf16 %v761_v60, %v760_v54 }
 0x2bf   : > { %v714_v4 = vmul.f32 %v2314_v62, %v645_v59  ;;  %v764_v6 = vsel %vm740_vm8, %v713_v49, 0.0 }
 0x2c0   : > { %v2316_v8 = vpop.eup %2315  ;;  %v777_v10 = vrot.slane %v768_v53, 4 }
 0x2c1   : > { %v711_v12 = vmul.f32 %v2316_v8, %v642_v5  ;;  %v765_v13 = vsel %vm741_vm9, %v714_v4, 0.0 }
 0x2c2   : > { %v2318_v14 = vpop.eup %2317  ;;  %v770_v16 = vpack.c.bf16 %v765_v13, %v764_v6  ;;  %789 = vst [vmem:[#allocation2] sm:$0xf0] %v777_v10 }
 0x2c3   : > { %v712_v17 = vmul.f32 %v2318_v14, %v643_v57  ;;  %v762_v61 = vsel %vm738_vm10, %v711_v12, 0.0 }
 0x2c4   : > { %v2320_v19 = vpop.eup %2319  ;;  %v780_v31 = vrot.slane %v770_v16, 4 }
 0x2c5   : > { %v715_v21 = vmul.f32 %v2320_v19, %v646_v18  ;;  %v763_v25 = vsel %vm739_vm11, %v712_v17, 0.0 }
 0x2c6   : > { %v2322_v27 = vpop.eup %2321  ;;  %v769_v3 = vpack.c.bf16 %v763_v25, %v762_v61 }
 0x2c7   : > { %v716_v26 = vmul.f32 %v2322_v27, %v647_v22  ;;  %v766_v28 = vsel %vm742_vm12, %v715_v21, 0.0 }
 0x2c8   : > { %v778_v29 = vrot.slane %v769_v3, 4 }
 0x2c9   : > { %v767_v33 = vsel %vm743_vm13, %v716_v26, 0.0  ;;  %796 = sbr.rel (%p3481_p10) target bundleno = 1286 (0x506), region = 72 }
 0x2ca   : > { %v771_v35 = vpack.c.bf16 %v767_v33, %v766_v28  ;;  %v779_v7 = vsel %vm776_vm14, %v777_v10, %v778_v29  ;;  %v781_v36 = vsel %vm776_vm14, %v778_v29, %v780_v31 }
 0x2cb   : > { %790 = vst [vmem:[#allocation2 + $0x8] sm:$0xff] %v779_v7  ;;  %791 = vst [vmem:[#allocation2 + $0x10] sm:$0xff] %v781_v36 }
 0x2cc   : > { %v782_v37 = vrot.slane %v771_v35, 4 }
 0x2ce   : > { %v783_v39 = vsel %vm776_vm14, %v780_v31, %v782_v37  ;;  %793 = vst [vmem:[#allocation2 + $0x20] sm:$0xf] %v782_v37 }
 0x2cf   : > { %792 = vst [vmem:[#allocation2 + $0x18] sm:$0xff] %v783_v39 }
 0x2d0   : > { %2636 = dma.done.wait [#allocation4], 48 }
 0x2d1   : > { %2637 = vsyncadd [#allocation4], 4294967248  ;;  %vm801_vm15 = vcmask 1042432   ;;  %v800_v11 = vld [vmem:[#allocation3] sm:$0x7]  ;;  %v2688_v55 = vmov 0  }
 0x2d2   : > { %v802_v34 = vsel %vm801_vm15, %v800_v11, 0.0  ;;  %v2323_v41 = vld [vmem:[#allocation8 + $0x4] ss:$8 sps:$4 sm:$0xff]   ;;  %v2325_v42 = vld [vmem:[#allocation8] ss:$8 sps:$4 sm:$0xff]   ;;  %944 = vmatprep.mubr.bf16.mxu0 %v2688_v55 }
 0x2d3   : > { %803 = vadd.xlane.f32.xlu0 %v802_v34  ;;  %v2326_v23 = vld [vmem:[#allocation8 + $0x14] ss:$8 sps:$4 sm:$0xff]   ;;  %912 = vmatprep.subr.bf16.mxu0 %v2323_v41  ;;  %v2328_v30 = vld [vmem:[#allocation8 + $0x10] ss:$8 sps:$4 sm:$0xff]   ;;  %v2329_v43 = vld [vmem:[#allocation8 + $0x24] ss:$8 sps:$4 sm:$0xff]  }
 0x2d4   : > { %913 = vmatpush1.bf16.msra.mxu0 %v2325_v42  ;;  %v2331_v44 = vld [vmem:[#allocation8 + $0x20] ss:$8 sps:$4 sm:$0xff]   ;;  %v2332_v24 = vld [vmem:[#allocation8 + $0x34] ss:$8 sps:$4 sm:$0xff]   ;;  %v2334_v48 = vld [vmem:[#allocation8 + $0x30] ss:$8 sps:$4 sm:$0xff]  }
 0x2d5   : > { %914 = vmatprep.subr.bf16.mxu0 %v2326_v23  ;;  %v2335_v50 = vld [vmem:[#allocation8 + $0x44] ss:$8 sps:$4 sm:$0xff]   ;;  %v2337_v51 = vld [vmem:[#allocation8 + $0x40] ss:$8 sps:$4 sm:$0xff]   ;;  %v2338_v40 = vld [vmem:[#allocation8 + $0x54] ss:$8 sps:$4 sm:$0xff]  }
 0x2d6   : > { %v2340_v52 = vld [vmem:[#allocation8 + $0x50] ss:$8 sps:$4 sm:$0xff]   ;;  %v2341_v54 = vld [vmem:[#allocation8 + $0x64] ss:$8 sps:$4 sm:$0xff]   ;;  %v2343_v56 = vld [vmem:[#allocation8 + $0x60] ss:$8 sps:$4 sm:$0xff]  }
 0x2d7   : > { %v2344_v58 = vld [vmem:[#allocation8 + $0x74] ss:$8 sps:$4 sm:$0xff]   ;;  %v2346_v49 = vld [vmem:[#allocation8 + $0x70] ss:$8 sps:$4 sm:$0xff]  }
 0x2d8   : > { %915 = vmatpush1.bf16.msra.mxu0 %v2328_v30  ;;  %v2016_v4 = vld [vmem:[%s3442_s4 + $0x1] ss:$0 sm:$0xff]  ;;  %v2015_v14 = vld [vmem:[%s3442_s4] ss:$0 sm:$0xff]  ;;  %v982_v25 = vld [vmem:[#allocation2] sm:$0xc] }
 0x2d9   : > { %916 = vmatprep.subr.bf16.mxu0 %v2329_v43 }
 0x2dc   : > { %917 = vmatpush1.bf16.msra.mxu0 %v2331_v44 }
 0x2dd   : > { %918 = vmatprep.subr.bf16.mxu0 %v2332_v24 }
 0x2e0   : > { %919 = vmatpush1.bf16.msra.mxu0 %v2334_v48 }
 0x2e1   : > { %920 = vmatprep.subr.bf16.mxu0 %v2335_v50 }
 0x2e4   : > { %921 = vmatpush1.bf16.msra.mxu0 %v2337_v51 }
 0x2e5   : > { %922 = vmatprep.subr.bf16.mxu0 %v2338_v40 }
 0x2e8   : > { %923 = vmatpush1.bf16.msra.mxu0 %v2340_v52 }
 0x2e9   : > { %924 = vmatprep.subr.bf16.mxu0 %v2341_v54 }
 0x2ec   : > { %925 = vmatpush1.bf16.msra.mxu0 %v2343_v56 }
 0x2ed   : > { %926 = vmatprep.subr.bf16.mxu0 %v2344_v58 }
 0x2f0   : > { %927 = vmatpush1.bf16.msra.mxu0 %v2346_v49 }
 0x360   : > { %v804_v32 = vpop.xlane.xlu0 %803 }
 0x361   : > { %v805_v45 = vmul.f32 0.0078125, %v804_v32 }
 0x363   : > { %v806_v47 = vsub.f32 %v800_v11, %v805_v45 }
 0x365   : > { %v807_v38 = vmul.f32 %v806_v47, %v806_v47 }
 0x367   : > { %v808_v46 = vsel %vm801_vm15, %v807_v38, 0.0 }
 0x368   : > { %809 = vadd.xlane.f32.xlu0 %v808_v46 }
 0x3f5   : > { %v810_v59 = vpop.xlane.xlu0 %809 }
 0x3f6   : > { %v811_v60 = vmul.f32 0.0078125, %v810_v59 }
 0x3f8   : > { %v812_v62 = vadd.f32 1e-05, %v811_v60 }
 0x3fa   : > { %2347 = vrsqrt.f32 %v812_v62 }
 0x404   : > { %v2348_v63 = vpop.eup %2347 }
 0x405   : > { %v814_v2 = vmul.f32 %v2348_v63, %v806_v47 }
 0x407   : > { %v815_v53 = vpack.c.bf16 %v814_v2, %v814_v2 }
 0x409   : > { %945 = vmatmul.mubr.bf16.vlgmr.msra.gmra.mrb[0].mxu0 %v815_v53 }
 0x4dc   : > { %v946_v5 = vpop.f32.mrb[0].mxu0 }
 0x4dd   : > { %v948_v6 = vpop.f32.mrb[1].mxu0  ;;  %v958_v15 = vadd.f32 %v2015_v14, %v946_v5 }
 0x4de   : > { %v964_v8 = vadd.f32 %v2016_v4, %v948_v6  ;;  %v950_v9 = vpop.f32.mrb[2].mxu0 }
 0x4df   : > { %v951_v10 = vpop.f32.mrb[3].mxu0 }
 0x4e0   : > { %v2017_v12 = vmul.f32 -1.442695, %v964_v8 }
 0x4e2   : > { %2349 = vpow2.f32 %v2017_v12 }
 0x4ec   : > { %v2350_v57 = vpop.eup %2349 }
 0x4ed   : > { %v968_v13 = vadd.f32 1.0, %v2350_v57 }
 0x4ef   : > { %2351 = vrcp.f32 %v968_v13 }
 0x4f9   : > { %v2352_v16 = vpop.eup %2351 }
 0x4fa   : > { %v971_v17 = vmul.f32 %v2352_v16, %v958_v15 }
 0x4fc   : > { %v972_v18 = vpack.c.bf16 %v971_v17, %v971_v17 }
 0x4fe   : > { %v974_v61 = vshrl.u32 %v972_v18, 16  ;;  %v977_v19 = vshll.u32 %v972_v18, 16 }
 0x500   : > { %v976_v21 = vrot.slane %v974_v61, 5  ;;  %v979_v22 = vrot.slane %v977_v19, 6 }
 0x502   : > { %v980_v27 = vor.u32 %v979_v22, %v976_v21 }
 0x504   : > { %v983_v3 = vsel %vm2937_vm4, %v980_v27, %v982_v25 }
 0x505   : > { %984 = vst [vmem:[#allocation2] sm:$0xc] %v983_v3 }
 0x506 PF: > { %p3482_p1 = scmp.gt.s32.totalorder %s3005_s21, 200 }
 0x508   : > { %987 = sbr.rel (%p3482_p1) target bundleno = 1857 (0x741), region = 76 }
 0x50f   : > { %2638 = dma.done.wait [#allocation4 + $0x1], 48 }
 0x510   : > { %2639 = vsyncadd [#allocation4 + $0x1], 4294967248  ;;  %vm994_vm0 = vcmask 1042432   ;;  %v993_v26 = vld [vmem:[#allocation3 + $0x4] sm:$0x7]  ;;  %v2689_v32 = vmov 0  }
 0x511   : > { %v995_v28 = vsel %vm994_vm0, %v993_v26, 0.0  ;;  %v2353_v29 = vld [vmem:[#allocation8 + $0x4] ss:$8 sps:$4 sm:$0xff]   ;;  %v2355_v31 = vld [vmem:[#allocation8] ss:$8 sps:$4 sm:$0xff]   ;;  %1137 = vmatprep.mubr.bf16.mxu0 %v2689_v32 }
 0x512   : > { %996 = vadd.xlane.f32.xlu0 %v995_v28  ;;  %v2356_v33 = vld [vmem:[#allocation8 + $0x14] ss:$8 sps:$4 sm:$0xff]   ;;  %1105 = vmatprep.subr.bf16.mxu0 %v2353_v29  ;;  %v2358_v35 = vld [vmem:[#allocation8 + $0x10] ss:$8 sps:$4 sm:$0xff]   ;;  %v2359_v0 = vld [vmem:[#allocation8 + $0x24] ss:$8 sps:$4 sm:$0xff]  }
 0x513   : > { %1106 = vmatpush1.bf16.msra.mxu0 %v2355_v31  ;;  %v2361_v7 = vld [vmem:[#allocation8 + $0x20] ss:$8 sps:$4 sm:$0xff]   ;;  %v2362_v36 = vld [vmem:[#allocation8 + $0x34] ss:$8 sps:$4 sm:$0xff]   ;;  %v2364_v42 = vld [vmem:[#allocation8 + $0x30] ss:$8 sps:$4 sm:$0xff]  }
 0x514   : > { %1107 = vmatprep.subr.bf16.mxu0 %v2356_v33  ;;  %v2365_v23 = vld [vmem:[#allocation8 + $0x44] ss:$8 sps:$4 sm:$0xff]   ;;  %v2367_v30 = vld [vmem:[#allocation8 + $0x40] ss:$8 sps:$4 sm:$0xff]   ;;  %v2368_v43 = vld [vmem:[#allocation8 + $0x54] ss:$8 sps:$4 sm:$0xff]  }
 0x515   : > { %v2370_v44 = vld [vmem:[#allocation8 + $0x50] ss:$8 sps:$4 sm:$0xff]   ;;  %v2371_v24 = vld [vmem:[#allocation8 + $0x64] ss:$8 sps:$4 sm:$0xff]   ;;  %v2373_v45 = vld [vmem:[#allocation8 + $0x60] ss:$8 sps:$4 sm:$0xff]  }
 0x516   : > { %v2374_v47 = vld [vmem:[#allocation8 + $0x74] ss:$8 sps:$4 sm:$0xff]   ;;  %v2376_v38 = vld [vmem:[#allocation8 + $0x70] ss:$8 sps:$4 sm:$0xff]  }
 0x517   : > { %1108 = vmatpush1.bf16.msra.mxu0 %v2358_v35  ;;  %v2036_v54 = vld [vmem:[%s3442_s4 + $0x1] ss:$0 sm:$0xff]  ;;  %v2035_v2 = vld [vmem:[%s3442_s4] ss:$0 sm:$0xff]  ;;  %v1169_v8 = vld [vmem:[#allocation2 + $0x20] sm:$0x30] }
 0x518   : > { %1109 = vmatprep.subr.bf16.mxu0 %v2359_v0 }
 0x51b   : > { %1110 = vmatpush1.bf16.msra.mxu0 %v2361_v7 }
 0x51c   : > { %1111 = vmatprep.subr.bf16.mxu0 %v2362_v36 }
 0x51f   : > { %1112 = vmatpush1.bf16.msra.mxu0 %v2364_v42 }
 0x520   : > { %1113 = vmatprep.subr.bf16.mxu0 %v2365_v23 }
 0x523   : > { %1114 = vmatpush1.bf16.msra.mxu0 %v2367_v30 }
 0x524   : > { %1115 = vmatprep.subr.bf16.mxu0 %v2368_v43 }
 0x527   : > { %1116 = vmatpush1.bf16.msra.mxu0 %v2370_v44 }
 0x528   : > { %1117 = vmatprep.subr.bf16.mxu0 %v2371_v24 }
 0x52b   : > { %1118 = vmatpush1.bf16.msra.mxu0 %v2373_v45 }
 0x52c   : > { %1119 = vmatprep.subr.bf16.mxu0 %v2374_v47 }
 0x52f   : > { %1120 = vmatpush1.bf16.msra.mxu0 %v2376_v38 }
 0x59f   : > { %v997_v37 = vpop.xlane.xlu0 %996 }
 0x5a0   : > { %v998_v39 = vmul.f32 0.0078125, %v997_v37 }
 0x5a2   : > { %v999_v11 = vsub.f32 %v993_v26, %v998_v39 }
 0x5a4   : > { %v1000_v34 = vmul.f32 %v999_v11, %v999_v11 }
 0x5a6   : > { %v1001_v41 = vsel %vm994_vm0, %v1000_v34, 0.0 }
 0x5a7   : > { %1002 = vadd.xlane.f32.xlu0 %v1001_v41 }
 0x634   : > { %v1003_v46 = vpop.xlane.xlu0 %1002 }
 0x635   : > { %v1004_v48 = vmul.f32 0.0078125, %v1003_v46 }
 0x637   : > { %v1005_v50 = vadd.f32 1e-05, %v1004_v48 }
 0x639   : > { %2377 = vrsqrt.f32 %v1005_v50 }
 0x643   : > { %v2378_v51 = vpop.eup %2377 }
 0x644   : > { %v1007_v40 = vmul.f32 %v2378_v51, %v999_v11 }
 0x646   : > { %v1008_v52 = vpack.c.bf16 %v1007_v40, %v1007_v40 }
 0x648   : > { %1138 = vmatmul.mubr.bf16.vlgmr.msra.gmra.mrb[0].mxu0 %v1008_v52 }
 0x71b   : > { %v1139_v55 = vpop.f32.mrb[0].mxu0 }
 0x71c   : > { %v1141_v56 = vpop.f32.mrb[1].mxu0  ;;  %v1151_v53 = vadd.f32 %v2035_v2, %v1139_v55 }
 0x71d   : > { %v1157_v58 = vadd.f32 %v2036_v54, %v1141_v56  ;;  %v1143_v49 = vpop.f32.mrb[2].mxu0 }
 0x71e   : > { %v1144_v59 = vpop.f32.mrb[3].mxu0 }
 0x71f   : > { %v2037_v60 = vmul.f32 -1.442695, %v1157_v58 }
 0x721   : > { %2379 = vpow2.f32 %v2037_v60 }
 0x72b   : > { %v2380_v62 = vpop.eup %2379 }
 0x72c   : > { %v1161_v63 = vadd.f32 1.0, %v2380_v62 }
 0x72e   : > { %2381 = vrcp.f32 %v1161_v63 }
 0x738   : > { %v2382_v4 = vpop.eup %2381 }
 0x739   : > { %v1164_v5 = vmul.f32 %v2382_v4, %v1151_v53 }
 0x73b   : > { %v1165_v6 = vpack.c.bf16 %v1164_v5, %v1164_v5 }
 0x73d   : > { %v1167_v9 = vrot.slane %v1165_v6, 4 }
 0x73f   : > { %v1170_v10 = vsel %vm2942_vm5, %v1167_v9, %v1169_v8 }
 0x740   : > { %1171 = vst [vmem:[#allocation2 + $0x20] sm:$0x30] %v1170_v10 }
 0x741 PF: > { %v1183_v15 = vsub.s32 0, %v3074_v20  ;;  %v1265_v17 = vsub.s32 1, %v3074_v20  ;;  %vm1277_vm1 = vcmask 1046528   ;;  %v1372_v3 = vsub.s32 2, %v3074_v20  ;;  %s1792_s21 = scalar_lea.sflag [#allocation7], %s2923_s17  ;;  %s3483_s20 = sld [smem:[#allocation26_spill]] }
 0x742   : > { %v2383_v12 = vld [vmem:[#allocation10] sm:$0xff]   ;;  %v2384_v57 = vld [vmem:[#allocation10 + $0x8] sm:$0xff]   ;;  %v2385_v13 = vld [vmem:[#allocation10 + $0x10] sm:$0xff]   ;;  %v1478_v0 = vsub.s32 3, %v3074_v20  ;;  %vm1208_vm2 = vsmask.f32 7424 }
 0x743   : > { %2082 = vmatprep.subr.bf16.mxu0 %v2383_v12  ;;  %2122 = vmatprep.subr.bf16.mxu1 %v2383_v12  ;;  %v2386_v14 = vld [vmem:[#allocation10 + $0x18] sm:$0xff]   ;;  %v1177_v1 = vld [vmem:[%s3441_s3] sm:$0x1]  ;;  %v1259_v16 = vld [vmem:[%s3441_s3] sm:$0x2]  ;;  %vm1384_vm5 = vcmask 1045504  }
 0x744   : > { %2083 = vmatpush3.bf16.msra.mxu0 %v2383_v12  ;;  %2130 = vmatpush3.bf16.msra.mxu1 %v2383_v12  ;;  %v1179_v18 = vpack.i.b16 %v1177_v1, %v1177_v1  ;;  %v1196_v61 = vshrl.u32 %v1177_v1, 16  ;;  %v1261_v19 = vpack.i.b16 %v1259_v16, %v1259_v16  ;;  %v1298_v21 = vshrl.u32 %v1259_v16, 16  ;;  %v1366_v22 = vld [vmem:[%s3441_s3] sm:$0x4]  ;;  %v2387_v28 = vld [vmem:[#allocation10 + $0x20] sm:$0xff]   ;;  %v3158_v7 = vld [vmem:[#allocation2 + $0x8] sm:$0xff] }
 0x745   : > { %2084 = vmatprep.subr.bf16.mxu0 %v2384_v57  ;;  %2123 = vmatprep.subr.bf16.mxu1 %v2384_v57  ;;  %v1172_v25 = vld [vmem:[#allocation2] sm:$0xfc]  ;;  %v1368_v27 = vpack.i.b16 %v1366_v22, %v1366_v22  ;;  %v1405_v26 = vshrl.u32 %v1366_v22, 16  ;;  %v3168_v41 = vld [vmem:[#allocation2 + $0x10] sm:$0xff]  ;;  %v2388_v45 = vld [vmem:[#allocation10 + $0x28] sm:$0xff]   ;;  %vm1490_vm6 = vcmask 1044480  }
 0x746   : > { %v3148_v29 = vrot.slane %v1179_v18, %v1183_v15  ;;  %v1197_v31 = vpack.i.b16 %v1196_v61, %v1196_v61  ;;  %v3150_v33 = vrot.slane %v1261_v19, %v1265_v17  ;;  %v3155_v35 = vld [vmem:[%s3441_s3] sm:$0x8]  ;;  %v1299_v37 = vpack.i.b16 %v1298_v21, %v1298_v21  ;;  %v1297_v50 = vld [vmem:[#allocation2] sm:$0xf0]  ;;  %v2390_v61 = vld [vmem:[#allocation10 + $0x38] sm:$0xff]  }
 0x747   : > { %v1195_v36 = vld [vmem:[#allocation2] sm:$0xf8]  ;;  %v3162_v39 = vrot.slane %v1368_v27, %v1372_v3  ;;  %v3164_v11 = vpack.i.b16 %v1405_v26, %v1405_v26  ;;  %v1474_v34 = vpack.i.b16 %v3155_v35, %v3155_v35  ;;  %vm1310_vm4 = vsmask.f32 6400  ;;  %p3484_p3 = scmp.ne.s32.totalorder %s3483_s20, 0 }
 0x748   : > { %2085 = vmatpush3.bf16.msra.mxu0 %v2384_v57  ;;  %2131 = vmatpush3.bf16.msra.mxu1 %v2384_v57  ;;  %v1185_v42 = vmul.bf16 %v3148_v29, %v1172_v25  ;;  %v1186_v23 = vmul.bf16 %v3148_v29, %v3158_v7  ;;  %v3173_v30 = vrot.slane %v1197_v31, %v1183_v15  ;;  %v2389_v2 = vld [vmem:[#allocation10 + $0x30] sm:$0xff]   ;;  %s2058_s13 = sshll.u32 (%p3484_p3), %s2658_s24, 3 }
 0x749   : > { %2086 = vmatprep.subr.bf16.mxu0 %v2385_v13  ;;  %2124 = vmatprep.subr.bf16.mxu1 %v2385_v13  ;;  %v1267_v43 = vmul.bf16 %v3150_v33, %v1195_v36  ;;  %v1268_v44 = vmul.bf16 %v3150_v33, %v3158_v7  ;;  %v1269_v24 = vmul.bf16 %v3150_v33, %v3168_v41  ;;  %s1800_s6 = ssub.s32 (%p3484_p3), 25, %s2058_s13 }
 0x74a   : > { %v3180_v32 = vrot.slane %v1299_v37, %v1265_v17  ;;  %v1190_v47 = vadd.bf16 0, %v1185_v42  ;;  %v1191_v38 = vadd.bf16 0, %v1186_v23  ;;  %v1203_v46 = vmul.bf16 %v3173_v30, %v1195_v36  ;;  %p1801_p2 = scmp.lt.s32.totalorder (%p3484_p3), %s1800_s6, 8 }
 0x74b   : > { %v1204_v48 = vmul.bf16 %v3173_v30, %v3158_v7  ;;  %v3187_v51 = vmul.bf16 %v3173_v30, %v3168_v41  ;;  %v1278_v40 = vrot.slane %v1267_v43, 1  ;;  %v1279_v52 = vrot.slane %v1268_v44, 1  ;;  %v1404_v43 = vld [vmem:[#allocation2] sm:$0xe0] }
 0x74c   : > { %2087 = vmatpush3.bf16.msra.mxu0 %v2385_v13  ;;  %2132 = vmatpush3.bf16.msra.mxu1 %v2385_v13  ;;  %v3189_v54 = vrot.slane %v1269_v24, 1  ;;  %v1210_v55 = vshrl.u32 %v1203_v46, 16  ;;  %v1212_v56 = vshll.u32 %v1203_v46, 16  ;;  %v1305_v63 = vmul.bf16 %v3180_v32, %v1297_v50 }
 0x74d   : > { %2088 = vmatprep.subr.bf16.mxu0 %v2386_v14  ;;  %2125 = vmatprep.subr.bf16.mxu1 %v2386_v14  ;;  %v1217_v58 = vshll.u32 %v1204_v48, 16  ;;  %v1221_v49 = vshrl.u32 %v1204_v48, 16  ;;  %v1225_v59 = vshll.u32 %v3187_v51, 16  ;;  %v1280_v60 = vsel %vm1277_vm1, %v1278_v40, %v1279_v52 }
 0x74e   : > { %v1282_v62 = vsel %vm1277_vm1, %v1279_v52, %v3189_v54  ;;  %v1214_v53 = vrot.slane %v1212_v56, 1  ;;  %v1306_v5 = vmul.bf16 %v3180_v32, %v3158_v7  ;;  %v1307_v6 = vmul.bf16 %v3180_v32, %v3168_v41 }
 0x74f   : > { %v1219_v4 = vrot.slane %v1217_v58, 1  ;;  %v3200_v8 = vrot.slane %v1225_v59, 1  ;;  %v1312_v9 = vshrl.u32 %v1305_v63, 16  ;;  %v1315_v10 = vshll.u32 %v1305_v63, 16 }
 0x750   : > { %2089 = vmatpush3.bf16.msra.mxu0 %v2386_v14  ;;  %2133 = vmatpush3.bf16.msra.mxu1 %v2386_v14  ;;  %v1374_v12 = vmul.bf16 %v3162_v39, %v1297_v50  ;;  %v1215_v57 = vor.u32 %v1214_v53, %v1210_v55  ;;  %v1320_v14 = vshrl.u32 %v1306_v5, 16  ;;  %v1323_v1 = vshll.u32 %v1306_v5, 16 }
 0x751   : > { %2090 = vmatprep.subr.bf16.mxu0 %v2387_v28  ;;  %2126 = vmatprep.subr.bf16.mxu1 %v2387_v28  ;;  %v1223_v13 = vor.u32 %v1221_v49, %v1219_v4  ;;  %v1314_v15 = vrot.slane %v1312_v9, 1  ;;  %v1317_v16 = vrot.slane %v1315_v10, 2  ;;  %v1329_v17 = vshrl.u32 %v1307_v6, 16 }
 0x752   : > { %v1332_v18 = vshll.u32 %v1307_v6, 16  ;;  %v1220_v19 = vsel %vm1208_vm2, %v1215_v57, %v1219_v4  ;;  %v1322_v22 = vrot.slane %v1320_v14, 1  ;;  %v1325_v25 = vrot.slane %v1323_v1, 2 }
 0x753   : > { %v1228_v21 = vsel %vm1208_vm2, %v1223_v13, %v3200_v8  ;;  %v1253_v27 = vadd.bf16 %v1220_v19, %v1190_v47  ;;  %v1331_v31 = vrot.slane %v1329_v17, 1  ;;  %v1375_v42 = vmul.bf16 %v3162_v39, %v3158_v7  ;;  %v3240_v13 = vld [vmem:[#allocation2 + $0x20] sm:$0x7] }
 0x754   : > { %2091 = vmatpush3.bf16.msra.mxu0 %v2387_v28  ;;  %2134 = vmatpush3.bf16.msra.mxu1 %v2387_v28  ;;  %v1254_v26 = vadd.bf16 %v1228_v21, %v1191_v38  ;;  %v1318_v28 = vor.u32 %v1317_v16, %v1314_v15  ;;  %v1326_v36 = vor.u32 %v1325_v25, %v1322_v22  ;;  %v1334_v37 = vrot.slane %v1332_v18, 2 }
 0x755   : > { %2092 = vmatprep.subr.bf16.mxu0 %v2388_v45  ;;  %2127 = vmatprep.subr.bf16.mxu1 %v2388_v45  ;;  %v1376_v23 = vmul.bf16 %v3162_v39, %v3168_v41  ;;  %v1292_v44 = vadd.bf16 %v1280_v60, %v1253_v27  ;;  %v3213_v47 = vrot.slane %v3164_v11, %v1372_v3  ;;  %v1386_v48 = vrot.slane %v1375_v42, 2 }
 0x756   : > { %v1293_v24 = vadd.bf16 %v1282_v62, %v1254_v26  ;;  %v1327_v38 = vsel %vm1310_vm4, %v1318_v28, %v1326_v36  ;;  %v3216_v46 = vor.u32 %v1334_v37, %v1331_v31  ;;  %v3235_v49 = vrot.slane %v1474_v34, %v1478_v0 }
 0x757   : > { %v3218_v50 = vrot.slane %v1376_v23, 2  ;;  %v1360_v40 = vadd.bf16 %v1327_v38, %v1292_v44  ;;  %v1412_v52 = vmul.bf16 %v3213_v47, %v1404_v43  ;;  %v1413_v55 = vmul.bf16 %v3213_v47, %v3158_v7 }
 0x758   : > { %2093 = vmatpush3.bf16.msra.mxu0 %v2388_v45  ;;  %2135 = vmatpush3.bf16.msra.mxu1 %v2388_v45  ;;  %v1385_v45 = vrot.slane %v1374_v12, 2  ;;  %v1414_v3 = vmul.bf16 %v3213_v47, %v3168_v41  ;;  %v1336_v11 = vsel %vm1310_vm4, %v1326_v36, %v3216_v46  ;;  %v1480_v20 = vmul.bf16 %v3235_v49, %v1404_v43  ;;  %v3238_v12 = vld [vmem:[#allocation2 + $0x18] sm:$0xff] }
 0x759   : > { %2094 = vmatprep.subr.bf16.mxu0 %v2389_v2  ;;  %2128 = vmatprep.subr.bf16.mxu1 %v2389_v2  ;;  %v1389_v58 = vsel %vm1384_vm5, %v1386_v48, %v3218_v50  ;;  %v1361_v59 = vadd.bf16 %v1336_v11, %v1293_v24  ;;  %v1418_v62 = vshrl.u32 %v1412_v52, 16  ;;  %v1421_v63 = vshll.u32 %v1412_v52, 16  ;;  %v1258_v24 = vld [vmem:[#allocation2 + $0x20] sm:$0xf] }
 0x75a   : > { %v1387_v56 = vsel %vm1384_vm5, %v1385_v45, %v1386_v48  ;;  %v1429_v53 = vshll.u32 %v1413_v55, 16  ;;  %v1435_v4 = vshrl.u32 %v1414_v3, 16  ;;  %v1438_v5 = vshll.u32 %v1414_v3, 16  ;;  %v3274_v52 = vld [vmem:[%s3442_s4 + $0x2] ss:$0 sm:$0xff] }
 0x75b   : > { %v1399_v60 = vadd.bf16 %v1387_v56, %v1360_v40  ;;  %v1400_v6 = vadd.bf16 %v1389_v58, %v1361_v59  ;;  %v1420_v9 = vrot.slane %v1418_v62, 2  ;;  %v1423_v10 = vrot.slane %v1421_v63, 3 }
 0x75c   : > { %2095 = vmatpush3.bf16.msra.mxu0 %v2389_v2  ;;  %2136 = vmatpush3.bf16.msra.mxu1 %v2389_v2  ;;  %v1426_v2 = vshrl.u32 %v1413_v55, 16  ;;  %v1431_v0 = vrot.slane %v1429_v53, 3  ;;  %v1437_v34 = vrot.slane %v1435_v4, 2  ;;  %v1440_v57 = vrot.slane %v1438_v5, 3 }
 0x75d   : > { %2096 = vmatprep.subr.bf16.mxu0 %v2390_v61  ;;  %2129 = vmatprep.subr.bf16.mxu1 %v2390_v61  ;;  %v1424_v14 = vor.u32 %v1423_v10, %v1420_v9  ;;  %v1481_v1 = vmul.bf16 %v3235_v49, %v3158_v7  ;;  %v1482_v15 = vmul.bf16 %v3235_v49, %v3168_v41  ;;  %v1491_v16 = vrot.slane %v1480_v20, 3 }
 0x75e   : > { %v1428_v35 = vrot.slane %v1426_v2, 2  ;;  %v3246_v18 = vor.u32 %v1440_v57, %v1437_v34  ;;  %v1188_v19 = vmul.bf16 %v3148_v29, %v3238_v12  ;;  %v1206_v25 = vmul.bf16 %v3173_v30, %v3238_v12 }
 0x75f   : > { %v1492_v21 = vrot.slane %v1481_v1, 3  ;;  %v3252_v22 = vrot.slane %v1482_v15, 3  ;;  %v3258_v7 = vmul.bf16 %v3173_v30, %v3240_v13  ;;  %v1229_v23 = vshrl.u32 %v3187_v51, 16 }
 0x760   : > { %2097 = vmatpush3.bf16.msra.mxu0 %v2390_v61  ;;  %2137 = vmatpush3.bf16.msra.mxu1 %v2390_v61  ;;  %v1432_v17 = vor.u32 %v1431_v0, %v1428_v35  ;;  %v1187_v61 = vmul.bf16 %v3148_v29, %v3168_v41  ;;  %v1193_v41 = vadd.bf16 0, %v1188_v19  ;;  %v1233_v43 = vshll.u32 %v1206_v25, 16 }
 0x761   : > { %v1493_v37 = vsel %vm1490_vm6, %v1491_v16, %v1492_v21  ;;  %v1495_v42 = vsel %vm1490_vm6, %v1492_v21, %v3252_v22  ;;  %v1237_v44 = vshrl.u32 %v1206_v25, 16  ;;  %v1241_v30 = vshll.u32 %v3258_v7, 16 }
 0x762   : > { %v1433_v27 = vsel %vm360_vm3, %v1424_v14, %v1432_v17  ;;  %v1442_v26 = vsel %vm360_vm3, %v1432_v17, %v3246_v18  ;;  %v1192_v28 = vadd.bf16 0, %v1187_v61  ;;  %v1270_v48 = vmul.bf16 %v3150_v33, %v3238_v12 }
 0x763   : > { %v1466_v31 = vadd.bf16 %v1433_v27, %v1399_v60  ;;  %v1467_v36 = vadd.bf16 %v1442_v26, %v1400_v6  ;;  %v1271_v40 = vmul.bf16 %v3150_v33, %v1258_v24  ;;  %v1231_v55 = vor.u32 %v1229_v23, %v3200_v8  ;;  %v1365_v27 = vld [vmem:[#allocation2 + $0x20] sm:$0x1f] }
 0x764   : > { %v1235_v51 = vrot.slane %v1233_v43, 1  ;;  %v3277_v3 = vrot.slane %v1241_v30, 1  ;;  %v1308_v11 = vmul.bf16 %v3180_v32, %v3238_v12  ;;  %v1283_v63 = vrot.slane %v1270_v48, 1 }
 0x765   : > { %v1505_v45 = vadd.bf16 %v1493_v37, %v1466_v31  ;;  %v1506_v38 = vadd.bf16 %v1495_v42, %v1467_v36  ;;  %v3282_v2 = vrot.slane %v1271_v40, 1  ;;  %v1309_v15 = vmul.bf16 %v3180_v32, %v1258_v24 }
 0x766   : > { %v1236_v62 = vsel %vm1208_vm2, %v1231_v55, %v1235_v51  ;;  %v1239_v33 = vor.u32 %v1237_v44, %v1235_v51  ;;  %v1284_v10 = vsel %vm1277_vm1, %v3189_v54, %v1283_v63  ;;  %v1338_v16 = vshrl.u32 %v1308_v11, 16 }
 0x767   : > { %v1510_v56 = vunpack.c.l.bf16 %v1505_v45  ;;  %v1511_v58 = vunpack.c.h.bf16 %v1505_v45  ;;  %v1512_v59 = vunpack.c.l.bf16 %v1506_v38  ;;  %v1513_v60 = vunpack.c.h.bf16 %v1506_v38 }
 0x768   : > { %v1244_v6 = vsel %vm1208_vm2, %v1239_v33, %v3277_v3  ;;  %v1255_v9 = vadd.bf16 %v1236_v62, %v1192_v28  ;;  %v1286_v20 = vsel %vm1277_vm1, %v1283_v63, %v3282_v2  ;;  %v1341_v61 = vshll.u32 %v1308_v11, 16 }
 0x769   : > { %v3285_v53 = vadd.f32 %v3274_v52, %v1510_v56  ;;  %v3288_v8 = vadd.f32 %v3274_v52, %v1511_v58  ;;  %v3291_v4 = vadd.f32 %v3274_v52, %v1512_v59  ;;  %v3294_v5 = vadd.f32 %v3274_v52, %v1513_v60 }
 0x76a   : > { %v1256_v57 = vadd.bf16 %v1244_v6, %v1193_v41  ;;  %v1294_v1 = vadd.bf16 %v1284_v10, %v1255_v9  ;;  %v1377_v54 = vmul.bf16 %v3162_v39, %v3238_v12  ;;  %v1340_v19 = vrot.slane %v1338_v16, 1 }
 0x76b   : > { %v2039_v35 = vmul.f32 -1.442695, %v3285_v53  ;;  %v2040_v0 = vmul.f32 -1.442695, %v3288_v8  ;;  %v2041_v34 = vmul.f32 -1.442695, %v3291_v4  ;;  %v1378_v28 = vmul.bf16 %v3162_v39, %v1365_v27 }
 0x76c   : > { %v2042_v14 = vmul.f32 -1.442695, %v3294_v5  ;;  %v1295_v17 = vadd.bf16 %v1286_v20, %v1256_v57  ;;  %v1347_v21 = vshrl.u32 %v1309_v15, 16  ;;  %v1350_v25 = vshll.u32 %v1309_v15, 16  ;;  %v1471_v39 = vld [vmem:[#allocation2 + $0x20] sm:$0x3f] }
 0x76d   : > { %2391 = vpow2.f32 %v2039_v35  ;;  %v1343_v26 = vrot.slane %v1341_v61, 2  ;;  %v1390_v41 = vrot.slane %v1377_v54, 2  ;;  %v1415_v36 = vmul.bf16 %v3213_v47, %v3238_v12 }
 0x76e   : > { %2393 = vpow2.f32 %v2040_v0  ;;  %v1349_v31 = vrot.slane %v1347_v21, 1  ;;  %v1352_v32 = vrot.slane %v1350_v25, 2  ;;  %v3314_v23 = vrot.slane %v1378_v28, 2 }
 0x76f   : > { %2395 = vpow2.f32 %v2041_v34  ;;  %v1344_v37 = vor.u32 %v1343_v26, %v1340_v19  ;;  %v1391_v42 = vsel %vm1384_vm5, %v3218_v50, %v1390_v41  ;;  %v1416_v43 = vmul.bf16 %v3213_v47, %v1365_v27 }
 0x770   : > { %2397 = vpow2.f32 %v2042_v14  ;;  %v3317_v44 = vor.u32 %v1352_v32, %v1349_v31  ;;  %v1444_v30 = vshrl.u32 %v1415_v36, 16  ;;  %v1447_v24 = vshll.u32 %v1415_v36, 16 }
 0x771   : > { %v1483_v45 = vmul.bf16 %v3235_v49, %v3238_v12  ;;  %v1345_v38 = vsel %vm1310_vm4, %v3216_v46, %v1344_v37  ;;  %v1393_v48 = vsel %vm1384_vm5, %v1390_v41, %v3314_v23  ;;  %v1453_v40 = vshrl.u32 %v1416_v43, 16 }
 0x772   : > { %v1456_v50 = vshll.u32 %v1416_v43, 16  ;;  %v1354_v55 = vsel %vm1310_vm4, %v1344_v37, %v3317_v44  ;;  %v1362_v47 = vadd.bf16 %v1345_v38, %v1294_v1  ;;  %v1446_v51 = vrot.slane %v1444_v30, 2 }
 0x773   : > { %v1449_v11 = vrot.slane %v1447_v24, 3  ;;  %v1363_v56 = vadd.bf16 %v1354_v55, %v1295_v17  ;;  %v1455_v58 = vrot.slane %v1453_v40, 2  ;;  %v1484_v60 = vmul.bf16 %v3235_v49, %v1471_v39 }
 0x774   : > { %v1458_v59 = vrot.slane %v1456_v50, 3  ;;  %v1401_v12 = vadd.bf16 %v1391_v42, %v1362_v47  ;;  %v1496_v33 = vrot.slane %v1483_v45, 3  ;;  %v1189_v46 = vmul.bf16 %v3148_v29, %v3240_v13 }
 0x775   : > { %v1450_v62 = vor.u32 %v1449_v11, %v1446_v51  ;;  %v1402_v6 = vadd.bf16 %v1393_v48, %v1363_v56  ;;  %v1498_v10 = vrot.slane %v1484_v60, 3  ;;  %v1245_v20 = vshrl.u32 %v3258_v7, 16 }
 0x776   : > { %v1459_v9 = vor.u32 %v1458_v59, %v1455_v58  ;;  %v1497_v49 = vsel %vm1490_vm6, %v3252_v22, %v1496_v33  ;;  %v1194_v57 = vadd.bf16 0, %v1189_v46 }
 0x777   : > { %v2392_v63 = vpop.eup %2391  ;;  %v1451_v34 = vsel %vm360_vm3, %v3246_v18, %v1450_v62  ;;  %v1499_v13 = vsel %vm1490_vm6, %v1496_v33, %v1498_v10  ;;  %v1247_v61 = vor.u32 %v1245_v20, %v3277_v3 }
 0x778   : > { %v2394_v35 = vpop.eup %2393  ;;  %v1560_v0 = vadd.f32 1.0, %v2392_v63  ;;  %v1460_v15 = vsel %vm360_vm3, %v1450_v62, %v1459_v9  ;;  %v1468_v29 = vadd.bf16 %v1451_v34, %v1401_v12 }
 0x779   : > { %v2396_v14 = vpop.eup %2395  ;;  %v1561_v1 = vadd.f32 1.0, %v2394_v35  ;;  %v1469_v7 = vadd.bf16 %v1460_v15, %v1402_v6  ;;  %v1257_v22 = vadd.bf16 %v1247_v61, %v1194_v57 }
 0x77a   : > { %v2398_v16 = vpop.eup %2397  ;;  %v1562_v17 = vadd.f32 1.0, %v2396_v14  ;;  %2399 = vrcp.f32 %v1560_v0  ;;  %v1507_v18 = vadd.bf16 %v1497_v49, %v1468_v29 }
 0x77b   : > { %v1563_v54 = vadd.f32 1.0, %v2398_v16  ;;  %2401 = vrcp.f32 %v1561_v1  ;;  %v1508_v19 = vadd.bf16 %v1499_v13, %v1469_v7  ;;  %v1296_v28 = vadd.bf16 %v3282_v2, %v1257_v22 }
 0x77c   : > { %2403 = vrcp.f32 %v1562_v17  ;;  %v1514_v21 = vunpack.c.l.bf16 %v1507_v18  ;;  %v1515_v25 = vunpack.c.h.bf16 %v1507_v18 }
 0x77d   : > { %2405 = vrcp.f32 %v1563_v54  ;;  %v1516_v27 = vunpack.c.l.bf16 %v1508_v19  ;;  %v1517_v26 = vunpack.c.h.bf16 %v1508_v19  ;;  %v1364_v36 = vadd.bf16 %v3317_v44, %v1296_v28 }
 0x77e   : > { %v1528_v41 = vadd.f32 %v3274_v52, %v1514_v21  ;;  %v1529_v31 = vadd.f32 %v3274_v52, %v1515_v25 }
 0x77f   : > { %v1530_v32 = vadd.f32 %v3274_v52, %v1516_v27  ;;  %v1531_v3 = vadd.f32 %v3274_v52, %v1517_v26  ;;  %v1403_v24 = vadd.bf16 %v3314_v23, %v1364_v36 }
 0x780   : > { %v2043_v37 = vmul.f32 -1.442695, %v1528_v41  ;;  %v2044_v42 = vmul.f32 -1.442695, %v1529_v31 }
 0x781   : > { %v2045_v43 = vmul.f32 -1.442695, %v1530_v32  ;;  %v2046_v30 = vmul.f32 -1.442695, %v1531_v3  ;;  %v1470_v2 = vadd.bf16 %v1459_v9, %v1403_v24 }
 0x782   : > { %2407 = vpow2.f32 %v2043_v37 }
 0x783   : > { %2409 = vpow2.f32 %v2044_v42  ;;  %v1509_v50 = vadd.bf16 %v1498_v10, %v1470_v2 }
 0x784   : > { %v2400_v39 = vpop.eup %2399  ;;  %2411 = vpow2.f32 %v2045_v43 }
 0x785   : > { %v2402_v45 = vpop.eup %2401  ;;  %v1587_v38 = vmul.f32 %v2400_v39, %v3285_v53  ;;  %2413 = vpow2.f32 %v2046_v30  ;;  %v1518_v23 = vunpack.c.l.bf16 %v1509_v50 }
 0x786   : > { %v2404_v48 = vpop.eup %2403  ;;  %v1588_v40 = vmul.f32 %v2402_v45, %v3288_v8 }
 0x787   : > { %v2406_v44 = vpop.eup %2405  ;;  %v1589_v55 = vmul.f32 %v2404_v48, %v3291_v4  ;;  %v1532_v59 = vadd.f32 %v3274_v52, %v1518_v23 }
 0x788   : > { %v1590_v47 = vmul.f32 %v2406_v44, %v3294_v5  ;;  %v1596_v51 = vpack.c.bf16 %v1588_v40, %v1587_v38  ;;  %v2048_v38 = vld [vmem:[%s3442_s4 + $0x3] ss:$0 sm:$0xff] }
 0x789   : > { %v2047_v8 = vmul.f32 -1.442695, %v1532_v59 }
 0x78a   : > { %v1597_v11 = vpack.c.bf16 %v1590_v47, %v1589_v55  ;;  %v1623_v56 = vshrl.u32 %v1596_v51, 16  ;;  %v1626_v58 = vshll.u32 %v1596_v51, 16 }
 0x78b   : > { %2415 = vpow2.f32 %v2047_v8 }
 0x78c   : > { %v1625_v60 = vrot.slane %v1623_v56, 2  ;;  %v1628_v53 = vrot.slane %v1626_v58, 3  ;;  %v1631_v12 = vshrl.u32 %v1597_v11, 16  ;;  %v1634_v62 = vshll.u32 %v1597_v11, 16  ;;  %v2408_v33 = vpop.eup %2407 }
 0x78d   : > { %v2410_v46 = vpop.eup %2409  ;;  %v1564_v4 = vadd.f32 1.0, %v2408_v33 }
 0x78e   : > { %v1629_v63 = vor.u32 %v1628_v53, %v1625_v60  ;;  %v1633_v6 = vrot.slane %v1631_v12, 2  ;;  %v1636_v9 = vrot.slane %v1634_v62, 3  ;;  %v2412_v10 = vpop.eup %2411  ;;  %v1565_v5 = vadd.f32 1.0, %v2410_v46 }
 0x78f   : > { %v2414_v20 = vpop.eup %2413  ;;  %v1566_v0 = vadd.f32 1.0, %v2412_v10  ;;  %2417 = vrcp.f32 %v1564_v4 }
 0x790   : > { %v1637_v35 = vor.u32 %v1636_v9, %v1633_v6  ;;  %v1567_v34 = vadd.f32 1.0, %v2414_v20  ;;  %2419 = vrcp.f32 %v1565_v5 }
 0x791   : > { %2421 = vrcp.f32 %v1566_v0 }
 0x792   : > { %v1638_v52 = vsel %vm360_vm3, %v1629_v63, %v1637_v35  ;;  %2423 = vrcp.f32 %v1567_v34 }
 0x793   : > { %2098 = vmatprep.mubr.bf16.mxu0 %v1638_v52 }
 0x795   : > { %v2416_v49 = vpop.eup %2415 }
 0x796   : > { %v1568_v14 = vadd.f32 1.0, %v2416_v49 }
 0x798   : > { %2425 = vrcp.f32 %v1568_v14 }
 0x799   : > { %v2418_v57 = vpop.eup %2417 }
 0x79a   : > { %v2420_v1 = vpop.eup %2419  ;;  %v1591_v15 = vmul.f32 %v2418_v57, %v1528_v41 }
 0x79b   : > { %v2422_v29 = vpop.eup %2421  ;;  %v1592_v13 = vmul.f32 %v2420_v1, %v1529_v31 }
 0x79c   : > { %v2424_v16 = vpop.eup %2423  ;;  %v1593_v17 = vmul.f32 %v2422_v29, %v1530_v32 }
 0x79d   : > { %v1594_v7 = vmul.f32 %v2424_v16, %v1531_v3  ;;  %v1598_v61 = vpack.c.bf16 %v1592_v13, %v1591_v15 }
 0x79f   : > { %v1599_v54 = vpack.c.bf16 %v1594_v7, %v1593_v17  ;;  %v1640_v18 = vshrl.u32 %v1598_v61, 16  ;;  %v1643_v19 = vshll.u32 %v1598_v61, 16 }
 0x7a1   : > { %v1642_v22 = vrot.slane %v1640_v18, 2  ;;  %v1645_v21 = vrot.slane %v1643_v19, 3  ;;  %v1649_v25 = vshrl.u32 %v1599_v54, 16  ;;  %v1652_v27 = vshll.u32 %v1599_v54, 16 }
 0x7a2   : > { %v2426_v37 = vpop.eup %2425 }
 0x7a3   : > { %v1646_v26 = vor.u32 %v1645_v21, %v1642_v22  ;;  %v1651_v28 = vrot.slane %v1649_v25, 2  ;;  %v1654_v36 = vrot.slane %v1652_v27, 3  ;;  %v1595_v31 = vmul.f32 %v2426_v37, %v1532_v59 }
 0x7a5   : > { %v1655_v42 = vor.u32 %v1654_v36, %v1651_v28  ;;  %v1647_v41 = vsel %vm360_vm3, %v1637_v35, %v1646_v26  ;;  %v1600_v3 = vpack.c.bf16 %v1595_v31, %v1595_v31 }
 0x7a6   : > { %2099 = vmatmul.mubr.bf16.vlgmr.msra.gmra.mrb[0].mxu0 %v1647_v41 }
 0x7a7   : > { %v1656_v32 = vsel %vm360_vm3, %v1646_v26, %v1655_v42  ;;  %v1658_v43 = vshrl.u32 %v1600_v3, 16  ;;  %v1661_v30 = vshll.u32 %v1600_v3, 16 }
 0x7a8   : > { %2102 = vmatprep.mubr.bf16.mxu1 %v1656_v32 }
 0x7a9   : > { %v1660_v24 = vrot.slane %v1658_v43, 2  ;;  %v1663_v39 = vrot.slane %v1661_v30, 3 }
 0x7ab   : > { %v1664_v2 = vor.u32 %v1663_v39, %v1660_v24 }
 0x7ad   : > { %v1665_v45 = vsel %vm360_vm3, %v1655_v42, %v1664_v2 }
 0x7ae   : > { %2103 = vmatmul.mubr.bf16.vlgmr.msra.gmra.mrb[0].mxu1 %v1665_v45 }
 0x879   : > { %v2100_v48 = vpop.f32.mrb[0].mxu0 }
 0x87a   : > { %v1761_v40 = vadd.f32 %v2100_v48, %v2048_v38  ;;  %v1752_v50 = vpop.f32.mrb[1].mxu0 }
 0x87b   : > { %v1753_v44 = vadd.f32 %v2048_v38, %v1752_v50  ;;  %v2101_v55 = vpop.f32.mrb[2].mxu0 }
 0x87c   : > { %1785 = vst [vmem:[%s3110_s14 + $0x10] sm:$0xff] %v1761_v40  ;;  %v1764_v47 = vadd.f32 %v2101_v55, %v2048_v38  ;;  %v1755_v51 = vpop.f32.mrb[3].mxu0 }
 0x87d   : > { %1783 = vst [vmem:[%s3110_s14] sm:$0xff] %v1753_v44  ;;  %v1756_v23 = vadd.f32 %v2048_v38, %v1755_v51 }
 0x87e   : > { %1786 = vst [vmem:[%s3110_s14 + $0x18] sm:$0xff] %v1764_v47 }
 0x87f   : > { %1784 = vst [vmem:[%s3110_s14 + $0x8] sm:$0xff] %v1756_v23 }
 0x881   : > { %v2104_v11 = vpop.f32.mrb[0].mxu1  ;;  %1798 = sbr.rel (!%p3484_p3) target bundleno = 2215 (0x8a7), region = 80 }
 0x882   : > { %v1777_v56 = vadd.f32 %v2104_v11, %v2048_v38  ;;  %v1768_v58 = vpop.f32.mrb[1].mxu1 }
 0x883   : > { %v1769_v59 = vadd.f32 %v2048_v38, %v1768_v58  ;;  %v2105_v60 = vpop.f32.mrb[2].mxu1 }
 0x884   : > { %1789 = vst [vmem:[%s3110_s14 + $0x30] sm:$0xff] %v1777_v56  ;;  %v1780_v53 = vadd.f32 %v2105_v60, %v2048_v38  ;;  %v1771_v12 = vpop.f32.mrb[3].mxu1 }
 0x885   : > { %1787 = vst [vmem:[%s3110_s14 + $0x20] sm:$0xff] %v1769_v59  ;;  %v1772_v62 = vadd.f32 %v2048_v38, %v1771_v12 }
 0x886   : > { %1790 = vst [vmem:[%s3110_s14 + $0x38] sm:$0xff] %v1780_v53 }
 0x887   : > { %1788 = vst [vmem:[%s3110_s14 + $0x28] sm:$0xff] %v1772_v62 }
 0x888   : > { %s3508_s6 = smov (!%p1801_p2, %s1800_s6), 8 }
 0x889   : > { %s3369_s16 = sshll.u32 %s3508_s6, 7 }
 0x88a   : > { %s1805_s18 = ssub.s32 1024, %s3369_s16 }
 0x88b   : > { %1806 = vsyncadd %s1792_s21, %s1805_s18  ;;  %p2060_p11 = scmp.ne.s32.totalorder %s3369_s16, 0  ;;  %s2139_s11 = smul.u32 25, %s2662_s25 }
 0x88c   : > { %s1813_s30 = sshll.u32 %s3110_s14, 4  ;;  %s3485_s12 = sld [smem:[#allocation29_spill]]  ;;  %s3377_s30 = int_to_ptr.vmem [resolvable:$true] %s1813_s30 }
 0x88d   : > { %s1809_s9 = sadd.s32 %s2139_s11, %s2058_s13  ;;  %s2568_s8 = scalar_lea.vmem %s3377_s30, %s3369_s16 }
 0x88e   : > { %s2061_s24 = sshll.u32 %s1809_s9, 7  ;;  %p2569_p5 = scmp.ne.s32.totalorder %s3377_s30, %s2568_s8 }
 0x88f   : > { %s2690_s19 = smov [#allocation11]  }
 0x890   : > { %p2570_p4 = pnand %p2569_p5, %p2060_p11  ;;  %s2572_s25 = sshll.u32 %s2690_s19, 4  ;;  %s2573_s25 = int_to_ptr.vmem [resolvable:$false] %s2572_s25 }
 0x891   : > { %s2574_s14 = scalar_lea.vmem %s2573_s25, 2048  ;;  %p2575_p0 = scmp.lt.s32.totalorder %s3377_s30, %s2573_s25 }
 0x892   : > { %s3382_s15 = scalar_lea.hbm %s3485_s12, %s2061_s24  ;;  %p2571_p12 = pneg %p2570_p4 }
 0x893   : > { %p2576_p13 = scmp.lt.s32.totalorder %s2574_s14, %s2568_s8 }
 0x895   : > { %p2577_p7 = por %p2576_p13, %p2575_p0 }
 0x897   : > { %p2578_p6 = pnand %p2577_p7, %p2571_p12 }
 0x899   : > { %2581 = shalt.err (!%p2578_p6)
}
 0x89a   : > { %s2582_s10 = scalar_lea.hbm %s3382_s15, %s3369_s16  ;;  %s2586_s6 = scalar_lea.hbm %s3485_s12, 6400 }
 0x89b   : > { %p2583_p8 = scmp.ne.s32.totalorder %s3382_s15, %s2582_s10  ;;  %p2587_p1 = scmp.lt.u32.totalorder %s3382_s15, %s3485_s12 }
 0x89c   : > { %p2588_p3 = scmp.lt.u32.totalorder %s2586_s6, %s2582_s10  ;;  %p2590_p5 = scmp.lt.u32.totalorder %s2582_s10, %s3382_s15 }
 0x89d   : > { %p2584_p9 = pnand %p2583_p8, %p2060_p11 }
 0x89e   : > { %p2589_p2 = por %p2588_p3, %p2587_p1 }
 0x89f   : > { %p2585_p10 = pneg %p2584_p9 }
 0x8a0   : > { %p2591_p4 = por %p2590_p5, %p2589_p2 }
 0x8a2   : > { %p2592_p12 = pnand %p2591_p4, %p2585_p10 }
 0x8a4   : > { %2595 = shalt.err (!%p2592_p12)
}
 0x8a5   : > { %s2691_s9 = smov 128   ;;  %s2692_s24 = smov 8  }
 0x8a6   : > { %1819 = dma.vmem_to_hbm [thread:$0]  (%p2060_p11), %s3377_s30, %s3369_s16, %s3382_s15, %s1792_s21, %s2691_s9, %s2691_s9, %s2692_s24  }
 0x8a7 PF: > { %s3486_s7 = sld [smem:[#allocation23_spill]]  ;;  %s3487_s29 = sld [smem:[#allocation27_spill]] }
 0x8a8   : > { %p2171_p0 = scmp.ge.s32.totalorder %s2674_s28, 2 }
 0x8ad   : > { %s1828_s8 = sand.u32 1, %s3486_s7   ;;  %p3488_p13 = scmp.ne.s32.totalorder %s3487_s29, 0 }
 0x8ae   : > { %s1829_s19 = scalar_lea.sflag [#allocation7], %s1828_s8 }
 0x8af   : > { %p2162_p7 = pnand %p2171_p0, %p3488_p13 }
 0x8b1   : > { %2641 = dma.done.wait (!%p2162_p7), %s1829_s19, 1024  }
 0x8b2   : > { %2643 = vsyncadd (!%p2162_p7), %s1829_s19, 4294966272  ;;  %s23_s28 = sadd.s32 1, %s2674_s28   ;;  %s3489_s25 = sld [smem:[#allocation28_spill]] }
 0x8b3   : > { %p20_p6 = scmp.ge.s32.totalorder %s23_s28, 10   ;;  %s3490_s17 = sld [smem:[#allocation24_spill]] }
 0x8b4   : > { %s3491_s16 = sld [smem:[#allocation25_spill]]  ;;  %s3492_s21 = smov %s2650_s22 }
 0x8b5   : > { %s3493_s22 = smov %s2654_s23  ;;  %s3495_s24 = smov %s2666_s26 }
 0x8b6   :  { %22 = sbr.rel (!%p20_p6) target bundleno = 10 (0xa), region = 124 }
 0x8b8   : > { %s3494_s23 = smov %s3489_s25  ;;  %s3496_s25 = smov %s2670_s27 }
 0x8b9   : > { %s3497_s26 = smov %s3490_s17 }
 0x8ba   : > { %s3498_s27 = smov %s3491_s16 }
 0x8bd   :  { %1834 = vsyncpa [#allocation6], 1 }
 0x8be   :  { %1836 = vsyncpa [#allocation6 + $0x1], 1 }
 0x8bf   :  { %1837 = vsyncpa [#allocation9], 1 }
 0x8c0   :  { %1838 = vsyncpa [#allocation7], 1 }
 0x8c1   :  { %1840 = vsyncpa [#allocation7 + $0x1], 1 }
 0x8c2   :  { %1841 = vsyncmov [#allocation4] }
 0x8c5   :  { %s1842_s30 = vpop.sfrf %1841 }
 0x8c6   :  { %p2066_p11 = scmp.ne.s32.totalorder %s1842_s30, 0 }
 0x8c8   :  { %1846 = shalt.err (%p2066_p11)  }
 0x8c9   :  { %1848 = vsyncmov [#allocation4 + $0x1] }
 0x8cc   :  { %s1849_s15 = vpop.sfrf %1848 }
 0x8cd   :  { %p2067_p8 = scmp.ne.s32.totalorder %s1849_s15, 0 }
 0x8cf   :  { %1853 = shalt.err (%p2067_p8)  }

</bundles_post_ra>
